<compile_context>
chip_gen: v7x
topology: tpu7x:2x2x1
jax: 0.10.0
libtpu: 0.0.40
codegen_flags: <defaults>
</compile_context>

<pallas_src>
import functools

import numpy as np

import jax
import jax.numpy as jnp
from jax.experimental import pallas as pl
from jax.experimental.pallas import tpu as pltpu


# ----------------------------------------------------------------------------
# Fused kernel: one (batch-block, stage) grid step.
# ----------------------------------------------------------------------------
def _edge_kernel(x_ref, we_ref, be_ref, wl_ref, bl_ref, ah_ref, awt_ref,
                 feat_ref, up_ref, cur_ref):
    # x_ref:    (NB, H, W, C)      bf16  stage-0 input block
    # we_ref:   (1, 9C, C)         bf16  enhance conv weights (this stage)
    # be_ref:   (1, 1, C)          f32   enhance bias
    # wl_ref:   (1, 9, C)          f32   loss conv weights, one row per tap
    # bl_ref:   (1, 1, 1)          f32   loss bias
    # ah_ref:   (NB*Hout, NB*H)    f32   block-diag bilinear row operator
    # awt_ref:  (W, Wout)          f32   bilinear column operator (A_w^T)
    # feat_ref: (NB, H, W, C)      bf16  stage feature output (NHWC)
    # up_ref:   (NB, Hout, Wout)   f32   upsampled loss map
    # cur_ref:  (NB, H, W, C)      bf16  VMEM carry of the running feature
    NB, H, W, C = cur_ref.shape
    M = NB * H * W
    Wout = awt_ref.shape[1]
    Hout = ah_ref.shape[0] // NB
    stage = pl.program_id(1)

    # Stage 0 consumes the kernel input; later stages consume the carried
    # feature of the previous stage (already resident in VMEM).
    @pl.when(stage == 0)
    def _():
        cur_ref[...] = x_ref[...]

    cur = cur_ref[...].reshape(M, C).astype(jnp.float32)          # (M, C) f32

    # Pixel coordinates of every row of the flattened (M, C) view; used to
    # zero conv taps that fall outside the image (3x3 conv, padding = 1).
    xcol = jax.lax.broadcasted_iota(jnp.int32, (NB, H, W, 1), 2).reshape(M, 1)
    yrow = jax.lax.broadcasted_iota(jnp.int32, (NB, H, W, 1), 1).reshape(M, 1)

    def conv_taps(a):
        """9 masked 3x3-conv taps of an (M, C) map, (dy, dx) row-major order.

        tap[m] = a[m + dy*W + dx], zeroed where (y+dy, x+dx) is out of bounds.
        Shifts are pltpu.roll on the sublane axis (XLU) + a VPU mask -- no MXU
        work and no O(M^2) shift operands."""
        outs = []
        for dy in (-1, 0, 1):
            for dx in (-1, 0, 1):
                if dy == 0 and dx == 0:
                    outs.append(a)
                    continue
                shift = (-(dy * W + dx)) % M     # roll: out[m] = a[m - shift]
                t = a if shift == 0 else pltpu.roll(a, shift, 0)
                conds = []
                if dy == -1:
                    conds.append(yrow > 0)
                if dy == 1:
                    conds.append(yrow < H - 1)
                if dx == -1:
                    conds.append(xcol > 0)
                if dx == 1:
                    conds.append(xcol < W - 1)
                valid = conds[0]
                for c in conds[1:]:
                    valid = jnp.logical_and(valid, c)
                outs.append(jnp.where(valid, t, 0.0))
        return outs

    # ---- enhance conv (3x3, pad 1) + bias + ReLU: one K = 9C MXU matmul ----
    patch = jnp.concatenate(
        [t.astype(jnp.bfloat16) for t in conv_taps(cur)], axis=-1)  # (M, 9C)
    acc = jnp.dot(patch, we_ref[0], preferred_element_type=jnp.float32)
    featf = jnp.maximum(acc + be_ref[0], 0.0)                       # (M, C) f32

    feat_b = featf.astype(jnp.bfloat16).reshape(NB, H, W, C)
    cur_ref[...] = feat_b          # carry to the next stage (stays in VMEM)
    feat_ref[...] = feat_b         # stage feature output (bf16, NHWC)

    # ---- loss conv (Cout = 1): per-tap VPU FMA + one XLU lane reduce -------
    # Keeping this off the MXU avoids paying full-width MXU output tiles for
    # a single output channel.
    wl = wl_ref[0]                                                  # (9, C)
    ftaps = conv_taps(featf)
    lacc = ftaps[0] * wl[0:1, :]
    for k in range(1, 9):
        lacc = lacc + ftaps[k] * wl[k:k + 1, :]
    lmap = jnp.sum(lacc.reshape(NB * H, W, C), axis=-1)             # (NB*H, W)

    # ---- bilinear upsample (align_corners=True): two small dense matmuls ---
    # Loss bias added after interpolation (exact: interp rows sum to 1).
    tmp = jnp.dot(lmap, awt_ref[...], preferred_element_type=jnp.float32)
    up = jnp.dot(ah_ref[...], tmp, preferred_element_type=jnp.float32)
    up_ref[...] = (up + bl_ref[0]).reshape(NB, Hout, Wout)


# ----------------------------------------------------------------------------
# Host-side constant builders (all shapes are static Python ints).
# ----------------------------------------------------------------------------
def _interp_matrix(out_size, in_size):
    """Bilinear interpolation matrix, align_corners=True (rows sum to 1)."""
    m = np.zeros((out_size, in_size), np.float32)
    if in_size == 1 or out_size == 1:
        m[:, 0] = 1.0
        return m
    scale = (in_size - 1) / (out_size - 1)
    for o in range(out_size):
        pos = o * scale
        lo = min(int(np.floor(pos)), in_size - 2)
        frac = pos - lo
        m[o, lo] += 1.0 - frac
        m[o, lo + 1] += frac
    return m


def _pick_batch_block(n, h, w, target_rows=1024):
    """Batch sub-block: make M = NB*H*W large enough to amortize per-grid-step
    overhead (~1024 rows), but keep >= 2 grid steps along the parallel axis so
    v7x's second TensorCore is not idle."""
    nb = max(1, min(n, target_rows // max(1, h * w)))
    while n % nb:
        nb -= 1
    if n >= 2 and n // nb < 2:
        nb = max(1, nb // 2)
        while n % nb:
            nb -= 1
    return nb


# ----------------------------------------------------------------------------
# EdgeExtraction module (vgg variant: C = 128).
# ----------------------------------------------------------------------------
def init_edge_extraction_params(key, stage_list, channels=128):
    """Per-stage weights: enhance Conv2d(C,C,3,1,1)+ReLU, loss Conv2d(C,1,3,1,1).

    Weights stored as (3, 3, Cin, Cout) (HWIO)."""
    params = []
    n_stages = len(stage_list) - 1
    keys = jax.random.split(key, n_stages * 2)
    for i in range(n_stages):
        we = jax.random.normal(keys[2 * i], (3, 3, channels, channels),
                               jnp.float32) * 0.05
        be = jnp.zeros((channels,), jnp.float32)
        wl = jax.random.normal(keys[2 * i + 1], (3, 3, channels, 1),
                               jnp.float32) * 0.05
        bl = jnp.zeros((1,), jnp.float32)
        params.append((we, be, wl, bl))
    return params


@functools.partial(jax.jit, static_argnums=(1,))
def edge_extraction_forward(base2_nchw, img_size, params):
    """Mirrors EdgeExtraction.forward.

    base2_nchw: (N, C, H, W) f32.  img_size: (H_out, W_out).
    Returns (edge_feature, edge_lossreturn), PyTorch NCHW layouts."""
    N, C, H, W = base2_nchw.shape
    Hout, Wout = img_size
    S = len(params)
    NB = _pick_batch_block(N, H, W)
    NI = N // NB

    # NHWC, bf16 MXU operands (accumulation stays f32 in-kernel).
    x_nhwc = jnp.transpose(base2_nchw, (0, 2, 3, 1)).astype(jnp.bfloat16)

    # Per-stage weights stacked on a leading stage axis: a single pallas_call
    # covers all stages (grid axis 1, "arbitrary"), the running feature is
    # carried in VMEM between stages.
    we_all = jnp.stack([p[0].reshape(9 * C, C) for p in params]
                       ).astype(jnp.bfloat16)                       # (S, 9C, C)
    be_all = jnp.stack([p[1].reshape(1, C) for p in params]
                       ).astype(jnp.float32)                        # (S, 1, C)
    wl_all = jnp.stack([p[2].reshape(9, C) for p in params]
                       ).astype(jnp.float32)                        # (S, 9, C)
    bl_all = jnp.stack([p[3].reshape(1, 1) for p in params]
                       ).astype(jnp.float32)                        # (S, 1, 1)

    # Bilinear interpolation operators (align_corners=True).
    a_h = _interp_matrix(Hout, H)
    a_w = _interp_matrix(Wout, W)
    ah = jnp.asarray(np.kron(np.eye(NB, dtype=np.float32), a_h))    # (NB*Hout, NB*H)
    awt = jnp.asarray(a_w.T)                                        # (W, Wout)

    feat_all, up_all = pl.pallas_call(
        _edge_kernel,
        out_shape=(
            jax.ShapeDtypeStruct((S * N, H, W, C), jnp.bfloat16),
            jax.ShapeDtypeStruct((S * N, Hout, Wout), jnp.float32),
        ),
        grid=(NI, S),
        in_specs=[
            pl.BlockSpec((NB, H, W, C), lambda i, s: (i, 0, 0, 0)),
            pl.BlockSpec((1, 9 * C, C), lambda i, s: (s, 0, 0)),
            pl.BlockSpec((1, 1, C), lambda i, s: (s, 0, 0)),
            pl.BlockSpec((1, 9, C), lambda i, s: (s, 0, 0)),
            pl.BlockSpec((1, 1, 1), lambda i, s: (s, 0, 0)),
            pl.BlockSpec((NB * Hout, NB * H), lambda i, s: (0, 0)),
            pl.BlockSpec((W, Wout), lambda i, s: (0, 0)),
        ],
        out_specs=(
            pl.BlockSpec((NB, H, W, C), lambda i, s: (s * NI + i, 0, 0, 0)),
            pl.BlockSpec((NB, Hout, Wout), lambda i, s: (s * NI + i, 0, 0)),
        ),
        scratch_shapes=[pltpu.VMEM((NB, H, W, C), jnp.bfloat16)],
        compiler_params=pltpu.CompilerParams(
            dimension_semantics=("parallel", "arbitrary"),
            vmem_limit_bytes=64 * 1024 * 1024),
    )(x_nhwc, we_all, be_all, wl_all, bl_all, ah, awt)

    feat_all = feat_all.reshape(S, N, H, W, C)
    up_all = up_all.reshape(S, N, Hout, Wout)

    edge_feature, edge_lossreturn = [], []
    for s in range(S):
        # NCHW / f32 only to mirror the PyTorch return layout; skip if the
        # downstream consumer accepts NHWC / bf16 directly.
        edge_feature.append(
            jnp.transpose(feat_all[s], (0, 3, 1, 2)).astype(jnp.float32))
        edge_lossreturn.append(up_all[s][:, None, :, :])
    return edge_feature, edge_lossreturn


# ----------------------------------------------------------------------------
# Pure-JAX/XLA reference (f32) for a loose numerical check (kernel uses bf16
# matmul operands and a bf16 feature carry, so tolerances are relaxed).
# ----------------------------------------------------------------------------
def _reference_forward(base2, img_size, params):
    Hout, Wout = img_size
    a_h = jnp.asarray(_interp_matrix(Hout, base2.shape[2]))
    a_w = jnp.asarray(_interp_matrix(Wout, base2.shape[3]))
    x = base2
    feats, ups = [], []
    for (we, be, wl, bl) in params:
        x = jax.lax.conv_general_dilated(
            x, we, (1, 1), ((1, 1), (1, 1)),
            dimension_numbers=('NCHW', 'HWIO', 'NCHW'),
            precision=jax.lax.Precision.HIGHEST)
        x = jnp.maximum(x + be[None, :, None, None], 0.0)
        feats.append(x)
        lm = jax.lax.conv_general_dilated(
            x, wl, (1, 1), ((1, 1), (1, 1)),
            dimension_numbers=('NCHW', 'HWIO', 'NCHW'),
            precision=jax.lax.Precision.HIGHEST)
        lm = lm + bl[None, :, None, None]
        up = jnp.einsum('oh,nhw,pw->nop', a_h, lm[:, 0], a_w,
                        precision=jax.lax.Precision.HIGHEST)
        ups.append(up[:, None])
    return feats, ups


if __name__ == "__main__":
    key = jax.random.PRNGKey(0)
    k_x, k_p = jax.random.split(key)

    stage_list = [0, 1, 2]                 # vgg variant -> 2 stages, C = 128
    N, C, H, W = 2, 128, 8, 8
    img_size = (16, 16)

    base2 = jax.random.normal(k_x, (N, C, H, W), jnp.float32)
    params = init_edge_extraction_params(k_p, stage_list, channels=C)

    edge_feature, edge_lossreturn = edge_extraction_forward(
        base2, img_size, params)
    jax.block_until_ready((edge_feature, edge_lossreturn))

    assert len(edge_feature) == len(stage_list) - 1
    assert all(f.shape == (N, C, H, W) for f in edge_feature)
    assert all(l.shape == (N, 1, img_size[0], img_size[1])
               for l in edge_lossreturn)

    ref_feat, ref_up = _reference_forward(base2, img_size, params)
    for got, ref in zip(edge_feature, ref_feat):
        np.testing.assert_allclose(np.asarray(got), np.asarray(ref),
                                   rtol=0.1, atol=0.1)
    for got, ref in zip(edge_lossreturn, ref_up):
        np.testing.assert_allclose(np.asarray(got), np.asarray(ref),
                                   rtol=0.1, atol=0.1)

    print("KERNEL_OK")
</pallas_src>

<mosaic_0001>
module attributes {stable_mosaic.version = 11 : i64} {
  func.func @_edge_kernel(%arg0: i32, %arg1: i32, %arg2: memref<1x8x8x128xbf16, #tpu.memory_space<vmem>>, %arg3: memref<1x1152x128xbf16, #tpu.memory_space<vmem>>, %arg4: memref<1x1x128xf32, #tpu.memory_space<vmem>>, %arg5: memref<1x9x128xf32, #tpu.memory_space<vmem>>, %arg6: memref<1x1x1xf32, #tpu.memory_space<vmem>>, %arg7: memref<16x8xf32, #tpu.memory_space<vmem>>, %arg8: memref<8x16xf32, #tpu.memory_space<vmem>>, %arg9: memref<1x8x8x128xbf16, #tpu.memory_space<vmem>>, %arg10: memref<1x16x16xf32, #tpu.memory_space<vmem>>, %arg11: memref<1x8x8x128xbf16, #tpu.memory_space<vmem>>) attributes {dimension_semantics = [#tpu.dimension_semantics<parallel>, #tpu.dimension_semantics<arbitrary>], iteration_bounds = array<i64: 2, 2>, scalar_prefetch = 0 : i64, scratch_operands = 1 : i64, tpu.core_type = #tpu.core_type<tc>, window_params = [{transform_indices = @transform_0, window_bounds = array<i64: 1, 8, 8, 128>}, {transform_indices = @transform_1, window_bounds = array<i64: 1, 1152, 128>}, {transform_indices = @transform_2, window_bounds = array<i64: 1, 1, 128>}, {transform_indices = @transform_3, window_bounds = array<i64: 1, 9, 128>}, {transform_indices = @transform_4, window_bounds = array<i64: 1, 1, 1>}, {pipeline_mode = #tpu.pipeline_mode<synchronous>, transform_indices = @transform_5, window_bounds = array<i64: 16, 8>}, {pipeline_mode = #tpu.pipeline_mode<synchronous>, transform_indices = @transform_6, window_bounds = array<i64: 8, 16>}, {transform_indices = @transform_7, window_bounds = array<i64: 1, 8, 8, 128>}, {transform_indices = @transform_8, window_bounds = array<i64: 1, 16, 16>}]} {
    %c0_i32 = arith.constant 0 : i32
    %0 = arith.cmpi eq, %arg1, %c0_i32 : i32
    %1 = arith.extui %0 : i1 to i32
    %c0_i32_0 = arith.constant 0 : i32
    %2 = arith.cmpi ne, %1, %c0_i32_0 : i32
    scf.if %2 {
      %c0_83 = arith.constant 0 : index
      %c0_84 = arith.constant 0 : index
      %c0_85 = arith.constant 0 : index
      %c0_86 = arith.constant 0 : index
      %218 = vector.load %arg2[%c0_83, %c0_84, %c0_85, %c0_86] : memref<1x8x8x128xbf16, #tpu.memory_space<vmem>>, vector<1x8x8x128xbf16>
      %c0_87 = arith.constant 0 : index
      %c0_88 = arith.constant 0 : index
      %c0_89 = arith.constant 0 : index
      %c0_90 = arith.constant 0 : index
      %219 = vector.load %arg11[%c0_87, %c0_88, %c0_89, %c0_90] : memref<1x8x8x128xbf16, #tpu.memory_space<vmem>>, vector<1x8x8x128xbf16>
      tpu.vector_store %arg11[%c0_87, %c0_88, %c0_89, %c0_90], %218 {strides = array<i32>} : memref<1x8x8x128xbf16, #tpu.memory_space<vmem>>, vector<1x8x8x128xbf16>,
    } else {
    }
    %c0 = arith.constant 0 : index
    %c0_1 = arith.constant 0 : index
    %c0_2 = arith.constant 0 : index
    %c0_3 = arith.constant 0 : index
    %3 = vector.load %arg11[%c0, %c0_1, %c0_2, %c0_3] : memref<1x8x8x128xbf16, #tpu.memory_space<vmem>>, vector<1x8x8x128xbf16>
    %4 = vector.shape_cast %3 : vector<1x8x8x128xbf16> to vector<64x128xbf16>
    %5 = arith.extf %4 : vector<64x128xbf16> to vector<64x128xf32>
    %6 = tpu.iota {dimensions = array<i32: 2>} : vector<1x8x8x1xi32>
    %7 = vector.shape_cast %6 : vector<1x8x8x1xi32> to vector<64x1xi32>
    %8 = tpu.iota {dimensions = array<i32: 1>} : vector<1x8x8x1xi32>
    %9 = vector.shape_cast %8 : vector<1x8x8x1xi32> to vector<64x1xi32>
    %c9_i32 = arith.constant 9 : i32
    %10 = tpu.dynamic_rotate %5 by %c9_i32 dim 0 : vector<64x128xf32>, i32 -> vector<64x128xf32>
    %c0_i32_4 = arith.constant 0 : i32
    %11 = vector.broadcast %c0_i32_4 : i32 to vector<64x1xi32>
    %12 = arith.cmpi sgt, %9, %11 : vector<64x1xi32>
    %c0_i32_5 = arith.constant 0 : i32
    %13 = vector.broadcast %c0_i32_5 : i32 to vector<64x1xi32>
    %14 = arith.cmpi sgt, %7, %13 : vector<64x1xi32>
    %15 = arith.andi %12, %14 : vector<64x1xi1>
    %cst = arith.constant 0.000000e+00 : f32
    %16 = vector.shape_cast %15 : vector<64x1xi1> to vector<64x1xi1>
    %17 = vector.broadcast %16 : vector<64x1xi1> to vector<64x128xi1>
    %18 = vector.broadcast %cst : f32 to vector<64x128xf32>
    %19 = arith.select %17, %10, %18 : vector<64x128xi1>, vector<64x128xf32>
    %c8_i32 = arith.constant 8 : i32
    %20 = tpu.dynamic_rotate %5 by %c8_i32 dim 0 : vector<64x128xf32>, i32 -> vector<64x128xf32>
    %c0_i32_6 = arith.constant 0 : i32
    %21 = vector.broadcast %c0_i32_6 : i32 to vector<64x1xi32>
    %22 = arith.cmpi sgt, %9, %21 : vector<64x1xi32>
    %cst_7 = arith.constant 0.000000e+00 : f32
    %23 = vector.shape_cast %22 : vector<64x1xi1> to vector<64x1xi1>
    %24 = vector.broadcast %23 : vector<64x1xi1> to vector<64x128xi1>
    %25 = vector.broadcast %cst_7 : f32 to vector<64x128xf32>
    %26 = arith.select %24, %20, %25 : vector<64x128xi1>, vector<64x128xf32>
    %c7_i32 = arith.constant 7 : i32
    %27 = tpu.dynamic_rotate %5 by %c7_i32 dim 0 : vector<64x128xf32>, i32 -> vector<64x128xf32>
    %c0_i32_8 = arith.constant 0 : i32
    %28 = vector.broadcast %c0_i32_8 : i32 to vector<64x1xi32>
    %29 = arith.cmpi sgt, %9, %28 : vector<64x1xi32>
    %c7_i32_9 = arith.constant 7 : i32
    %30 = vector.broadcast %c7_i32_9 : i32 to vector<64x1xi32>
    %31 = arith.cmpi slt, %7, %30 : vector<64x1xi32>
    %32 = arith.andi %29, %31 : vector<64x1xi1>
    %cst_10 = arith.constant 0.000000e+00 : f32
    %33 = vector.shape_cast %32 : vector<64x1xi1> to vector<64x1xi1>
    %34 = vector.broadcast %33 : vector<64x1xi1> to vector<64x128xi1>
    %35 = vector.broadcast %cst_10 : f32 to vector<64x128xf32>
    %36 = arith.select %34, %27, %35 : vector<64x128xi1>, vector<64x128xf32>
    %c1_i32 = arith.constant 1 : i32
    %37 = tpu.dynamic_rotate %5 by %c1_i32 dim 0 : vector<64x128xf32>, i32 -> vector<64x128xf32>
    %c0_i32_11 = arith.constant 0 : i32
    %38 = vector.broadcast %c0_i32_11 : i32 to vector<64x1xi32>
    %39 = arith.cmpi sgt, %7, %38 : vector<64x1xi32>
    %cst_12 = arith.constant 0.000000e+00 : f32
    %40 = vector.shape_cast %39 : vector<64x1xi1> to vector<64x1xi1>
    %41 = vector.broadcast %40 : vector<64x1xi1> to vector<64x128xi1>
    %42 = vector.broadcast %cst_12 : f32 to vector<64x128xf32>
    %43 = arith.select %41, %37, %42 : vector<64x128xi1>, vector<64x128xf32>
    %c63_i32 = arith.constant 63 : i32
    %44 = tpu.dynamic_rotate %5 by %c63_i32 dim 0 : vector<64x128xf32>, i32 -> vector<64x128xf32>
    %c7_i32_13 = arith.constant 7 : i32
    %45 = vector.broadcast %c7_i32_13 : i32 to vector<64x1xi32>
    %46 = arith.cmpi slt, %7, %45 : vector<64x1xi32>
    %cst_14 = arith.constant 0.000000e+00 : f32
    %47 = vector.shape_cast %46 : vector<64x1xi1> to vector<64x1xi1>
    %48 = vector.broadcast %47 : vector<64x1xi1> to vector<64x128xi1>
    %49 = vector.broadcast %cst_14 : f32 to vector<64x128xf32>
    %50 = arith.select %48, %44, %49 : vector<64x128xi1>, vector<64x128xf32>
    %c57_i32 = arith.constant 57 : i32
    %51 = tpu.dynamic_rotate %5 by %c57_i32 dim 0 : vector<64x128xf32>, i32 -> vector<64x128xf32>
    %c7_i32_15 = arith.constant 7 : i32
    %52 = vector.broadcast %c7_i32_15 : i32 to vector<64x1xi32>
    %53 = arith.cmpi slt, %9, %52 : vector<64x1xi32>
    %c0_i32_16 = arith.constant 0 : i32
    %54 = vector.broadcast %c0_i32_16 : i32 to vector<64x1xi32>
    %55 = arith.cmpi sgt, %7, %54 : vector<64x1xi32>
    %56 = arith.andi %53, %55 : vector<64x1xi1>
    %cst_17 = arith.constant 0.000000e+00 : f32
    %57 = vector.shape_cast %56 : vector<64x1xi1> to vector<64x1xi1>
    %58 = vector.broadcast %57 : vector<64x1xi1> to vector<64x128xi1>
    %59 = vector.broadcast %cst_17 : f32 to vector<64x128xf32>
    %60 = arith.select %58, %51, %59 : vector<64x128xi1>, vector<64x128xf32>
    %c56_i32 = arith.constant 56 : i32
    %61 = tpu.dynamic_rotate %5 by %c56_i32 dim 0 : vector<64x128xf32>, i32 -> vector<64x128xf32>
    %c7_i32_18 = arith.constant 7 : i32
    %62 = vector.broadcast %c7_i32_18 : i32 to vector<64x1xi32>
    %63 = arith.cmpi slt, %9, %62 : vector<64x1xi32>
    %cst_19 = arith.constant 0.000000e+00 : f32
    %64 = vector.shape_cast %63 : vector<64x1xi1> to vector<64x1xi1>
    %65 = vector.broadcast %64 : vector<64x1xi1> to vector<64x128xi1>
    %66 = vector.broadcast %cst_19 : f32 to vector<64x128xf32>
    %67 = arith.select %65, %61, %66 : vector<64x128xi1>, vector<64x128xf32>
    %c55_i32 = arith.constant 55 : i32
    %68 = tpu.dynamic_rotate %5 by %c55_i32 dim 0 : vector<64x128xf32>, i32 -> vector<64x128xf32>
    %c7_i32_20 = arith.constant 7 : i32
    %69 = vector.broadcast %c7_i32_20 : i32 to vector<64x1xi32>
    %70 = arith.cmpi slt, %9, %69 : vector<64x1xi32>
    %c7_i32_21 = arith.constant 7 : i32
    %71 = vector.broadcast %c7_i32_21 : i32 to vector<64x1xi32>
    %72 = arith.cmpi slt, %7, %71 : vector<64x1xi32>
    %73 = arith.andi %70, %72 : vector<64x1xi1>
    %cst_22 = arith.constant 0.000000e+00 : f32
    %74 = vector.shape_cast %73 : vector<64x1xi1> to vector<64x1xi1>
    %75 = vector.broadcast %74 : vector<64x1xi1> to vector<64x128xi1>
    %76 = vector.broadcast %cst_22 : f32 to vector<64x128xf32>
    %77 = arith.select %75, %68, %76 : vector<64x128xi1>, vector<64x128xf32>
    %78 = arith.truncf %19 : vector<64x128xf32> to vector<64x128xbf16>
    %79 = arith.truncf %26 : vector<64x128xf32> to vector<64x128xbf16>
    %80 = arith.truncf %36 : vector<64x128xf32> to vector<64x128xbf16>
    %81 = arith.truncf %43 : vector<64x128xf32> to vector<64x128xbf16>
    %82 = arith.truncf %5 : vector<64x128xf32> to vector<64x128xbf16>
    %83 = arith.truncf %50 : vector<64x128xf32> to vector<64x128xbf16>
    %84 = arith.truncf %60 : vector<64x128xf32> to vector<64x128xbf16>
    %85 = arith.truncf %67 : vector<64x128xf32> to vector<64x128xbf16>
    %86 = arith.truncf %77 : vector<64x128xf32> to vector<64x128xbf16>
    %87 = tpu.concatenate %78, %79, %80, %81, %82, %83, %84, %85, %86 in 1 : vector<64x128xbf16>, vector<64x128xbf16>, vector<64x128xbf16>, vector<64x128xbf16>, vector<64x128xbf16>, vector<64x128xbf16>, vector<64x128xbf16>, vector<64x128xbf16>, vector<64x128xbf16> -> vector<64x1152xbf16>
    %c0_23 = arith.constant 0 : index
    %c0_24 = arith.constant 0 : index
    %c0_25 = arith.constant 0 : index
    %88 = vector.load %arg3[%c0_23, %c0_24, %c0_25] : memref<1x1152x128xbf16, #tpu.memory_space<vmem>>, vector<1x1152x128xbf16>
    %89 = vector.shape_cast %88 : vector<1x1152x128xbf16> to vector<1152x128xbf16>
    %cst_26 = arith.constant dense<0.000000e+00> : vector<64x128xf32>
    %90 = tpu.matmul %87, %89, %cst_26 {dimension_numbers = #tpu.dot_dimension_numbers<[1], [0], [0], [1], [0, 0, 1, 1], [], []>} : vector<64x1152xbf16>, vector<1152x128xbf16>, vector<64x128xf32> -> vector<64x128xf32>
    %c0_27 = arith.constant 0 : index
    %c0_28 = arith.constant 0 : index
    %c0_29 = arith.constant 0 : index
    %91 = vector.load %arg4[%c0_27, %c0_28, %c0_29] : memref<1x1x128xf32, #tpu.memory_space<vmem>>, vector<1x1x128xf32>
    %92 = vector.shape_cast %91 : vector<1x1x128xf32> to vector<1x128xf32>
    %93 = vector.broadcast %92 : vector<1x128xf32> to vector<64x128xf32>
    %94 = arith.addf %90, %93 : vector<64x128xf32>
    %cst_30 = arith.constant 0.000000e+00 : f32
    %95 = vector.broadcast %cst_30 : f32 to vector<64x128xf32>
    %96 = arith.maximumf %94, %95 : vector<64x128xf32>
    %97 = arith.truncf %96 : vector<64x128xf32> to vector<64x128xbf16>
    %98 = vector.shape_cast %97 : vector<64x128xbf16> to vector<1x8x8x128xbf16>
    %c0_31 = arith.constant 0 : index
    %c0_32 = arith.constant 0 : index
    %c0_33 = arith.constant 0 : index
    %c0_34 = arith.constant 0 : index
    %99 = vector.load %arg11[%c0_31, %c0_32, %c0_33, %c0_34] : memref<1x8x8x128xbf16, #tpu.memory_space<vmem>>, vector<1x8x8x128xbf16>
    tpu.vector_store %arg11[%c0_31, %c0_32, %c0_33, %c0_34], %98 {strides = array<i32>} : memref<1x8x8x128xbf16, #tpu.memory_space<vmem>>, vector<1x8x8x128xbf16>,
    %c0_35 = arith.constant 0 : index
    %c0_36 = arith.constant 0 : index
    %c0_37 = arith.constant 0 : index
    %c0_38 = arith.constant 0 : index
    %100 = vector.load %arg9[%c0_35, %c0_36, %c0_37, %c0_38] : memref<1x8x8x128xbf16, #tpu.memory_space<vmem>>, vector<1x8x8x128xbf16>
    tpu.vector_store %arg9[%c0_35, %c0_36, %c0_37, %c0_38], %98 {strides = array<i32>} : memref<1x8x8x128xbf16, #tpu.memory_space<vmem>>, vector<1x8x8x128xbf16>,
    %c0_39 = arith.constant 0 : index
    %c0_40 = arith.constant 0 : index
    %c0_41 = arith.constant 0 : index
    %101 = vector.load %arg5[%c0_39, %c0_40, %c0_41] : memref<1x9x128xf32, #tpu.memory_space<vmem>>, vector<1x9x128xf32>
    %102 = vector.shape_cast %101 : vector<1x9x128xf32> to vector<9x128xf32>
    %c9_i32_42 = arith.constant 9 : i32
    %103 = tpu.dynamic_rotate %96 by %c9_i32_42 dim 0 : vector<64x128xf32>, i32 -> vector<64x128xf32>
    %c0_i32_43 = arith.constant 0 : i32
    %104 = vector.broadcast %c0_i32_43 : i32 to vector<64x1xi32>
    %105 = arith.cmpi sgt, %9, %104 : vector<64x1xi32>
    %c0_i32_44 = arith.constant 0 : i32
    %106 = vector.broadcast %c0_i32_44 : i32 to vector<64x1xi32>
    %107 = arith.cmpi sgt, %7, %106 : vector<64x1xi32>
    %108 = arith.andi %105, %107 : vector<64x1xi1>
    %cst_45 = arith.constant 0.000000e+00 : f32
    %109 = vector.shape_cast %108 : vector<64x1xi1> to vector<64x1xi1>
    %110 = vector.broadcast %109 : vector<64x1xi1> to vector<64x128xi1>
    %111 = vector.broadcast %cst_45 : f32 to vector<64x128xf32>
    %112 = arith.select %110, %103, %111 : vector<64x128xi1>, vector<64x128xf32>
    %c8_i32_46 = arith.constant 8 : i32
    %113 = tpu.dynamic_rotate %96 by %c8_i32_46 dim 0 : vector<64x128xf32>, i32 -> vector<64x128xf32>
    %c0_i32_47 = arith.constant 0 : i32
    %114 = vector.broadcast %c0_i32_47 : i32 to vector<64x1xi32>
    %115 = arith.cmpi sgt, %9, %114 : vector<64x1xi32>
    %cst_48 = arith.constant 0.000000e+00 : f32
    %116 = vector.shape_cast %115 : vector<64x1xi1> to vector<64x1xi1>
    %117 = vector.broadcast %116 : vector<64x1xi1> to vector<64x128xi1>
    %118 = vector.broadcast %cst_48 : f32 to vector<64x128xf32>
    %119 = arith.select %117, %113, %118 : vector<64x128xi1>, vector<64x128xf32>
    %c7_i32_49 = arith.constant 7 : i32
    %120 = tpu.dynamic_rotate %96 by %c7_i32_49 dim 0 : vector<64x128xf32>, i32 -> vector<64x128xf32>
    %c0_i32_50 = arith.constant 0 : i32
    %121 = vector.broadcast %c0_i32_50 : i32 to vector<64x1xi32>
    %122 = arith.cmpi sgt, %9, %121 : vector<64x1xi32>
    %c7_i32_51 = arith.constant 7 : i32
    %123 = vector.broadcast %c7_i32_51 : i32 to vector<64x1xi32>
    %124 = arith.cmpi slt, %7, %123 : vector<64x1xi32>
    %125 = arith.andi %122, %124 : vector<64x1xi1>
    %cst_52 = arith.constant 0.000000e+00 : f32
    %126 = vector.shape_cast %125 : vector<64x1xi1> to vector<64x1xi1>
    %127 = vector.broadcast %126 : vector<64x1xi1> to vector<64x128xi1>
    %128 = vector.broadcast %cst_52 : f32 to vector<64x128xf32>
    %129 = arith.select %127, %120, %128 : vector<64x128xi1>, vector<64x128xf32>
    %c1_i32_53 = arith.constant 1 : i32
    %130 = tpu.dynamic_rotate %96 by %c1_i32_53 dim 0 : vector<64x128xf32>, i32 -> vector<64x128xf32>
    %c0_i32_54 = arith.constant 0 : i32
    %131 = vector.broadcast %c0_i32_54 : i32 to vector<64x1xi32>
    %132 = arith.cmpi sgt, %7, %131 : vector<64x1xi32>
    %cst_55 = arith.constant 0.000000e+00 : f32
    %133 = vector.shape_cast %132 : vector<64x1xi1> to vector<64x1xi1>
    %134 = vector.broadcast %133 : vector<64x1xi1> to vector<64x128xi1>
    %135 = vector.broadcast %cst_55 : f32 to vector<64x128xf32>
    %136 = arith.select %134, %130, %135 : vector<64x128xi1>, vector<64x128xf32>
    %c63_i32_56 = arith.constant 63 : i32
    %137 = tpu.dynamic_rotate %96 by %c63_i32_56 dim 0 : vector<64x128xf32>, i32 -> vector<64x128xf32>
    %c7_i32_57 = arith.constant 7 : i32
    %138 = vector.broadcast %c7_i32_57 : i32 to vector<64x1xi32>
    %139 = arith.cmpi slt, %7, %138 : vector<64x1xi32>
    %cst_58 = arith.constant 0.000000e+00 : f32
    %140 = vector.shape_cast %139 : vector<64x1xi1> to vector<64x1xi1>
    %141 = vector.broadcast %140 : vector<64x1xi1> to vector<64x128xi1>
    %142 = vector.broadcast %cst_58 : f32 to vector<64x128xf32>
    %143 = arith.select %141, %137, %142 : vector<64x128xi1>, vector<64x128xf32>
    %c57_i32_59 = arith.constant 57 : i32
    %144 = tpu.dynamic_rotate %96 by %c57_i32_59 dim 0 : vector<64x128xf32>, i32 -> vector<64x128xf32>
    %c7_i32_60 = arith.constant 7 : i32
    %145 = vector.broadcast %c7_i32_60 : i32 to vector<64x1xi32>
    %146 = arith.cmpi slt, %9, %145 : vector<64x1xi32>
    %c0_i32_61 = arith.constant 0 : i32
    %147 = vector.broadcast %c0_i32_61 : i32 to vector<64x1xi32>
    %148 = arith.cmpi sgt, %7, %147 : vector<64x1xi32>
    %149 = arith.andi %146, %148 : vector<64x1xi1>
    %cst_62 = arith.constant 0.000000e+00 : f32
    %150 = vector.shape_cast %149 : vector<64x1xi1> to vector<64x1xi1>
    %151 = vector.broadcast %150 : vector<64x1xi1> to vector<64x128xi1>
    %152 = vector.broadcast %cst_62 : f32 to vector<64x128xf32>
    %153 = arith.select %151, %144, %152 : vector<64x128xi1>, vector<64x128xf32>
    %c56_i32_63 = arith.constant 56 : i32
    %154 = tpu.dynamic_rotate %96 by %c56_i32_63 dim 0 : vector<64x128xf32>, i32 -> vector<64x128xf32>
    %c7_i32_64 = arith.constant 7 : i32
    %155 = vector.broadcast %c7_i32_64 : i32 to vector<64x1xi32>
    %156 = arith.cmpi slt, %9, %155 : vector<64x1xi32>
    %cst_65 = arith.constant 0.000000e+00 : f32
    %157 = vector.shape_cast %156 : vector<64x1xi1> to vector<64x1xi1>
    %158 = vector.broadcast %157 : vector<64x1xi1> to vector<64x128xi1>
    %159 = vector.broadcast %cst_65 : f32 to vector<64x128xf32>
    %160 = arith.select %158, %154, %159 : vector<64x128xi1>, vector<64x128xf32>
    %c55_i32_66 = arith.constant 55 : i32
    %161 = tpu.dynamic_rotate %96 by %c55_i32_66 dim 0 : vector<64x128xf32>, i32 -> vector<64x128xf32>
    %c7_i32_67 = arith.constant 7 : i32
    %162 = vector.broadcast %c7_i32_67 : i32 to vector<64x1xi32>
    %163 = arith.cmpi slt, %9, %162 : vector<64x1xi32>
    %c7_i32_68 = arith.constant 7 : i32
    %164 = vector.broadcast %c7_i32_68 : i32 to vector<64x1xi32>
    %165 = arith.cmpi slt, %7, %164 : vector<64x1xi32>
    %166 = arith.andi %163, %165 : vector<64x1xi1>
    %cst_69 = arith.constant 0.000000e+00 : f32
    %167 = vector.shape_cast %166 : vector<64x1xi1> to vector<64x1xi1>
    %168 = vector.broadcast %167 : vector<64x1xi1> to vector<64x128xi1>
    %169 = vector.broadcast %cst_69 : f32 to vector<64x128xf32>
    %170 = arith.select %168, %161, %169 : vector<64x128xi1>, vector<64x128xf32>
    %171 = vector.extract_strided_slice %102 {offsets = [0, 0], sizes = [1, 128], strides = [1, 1]} : vector<9x128xf32> to vector<1x128xf32>
    %172 = vector.broadcast %171 : vector<1x128xf32> to vector<64x128xf32>
    %173 = arith.mulf %112, %172 : vector<64x128xf32>
    %174 = vector.extract_strided_slice %102 {offsets = [1, 0], sizes = [1, 128], strides = [1, 1]} : vector<9x128xf32> to vector<1x128xf32>
    %175 = vector.broadcast %174 : vector<1x128xf32> to vector<64x128xf32>
    %176 = arith.mulf %119, %175 : vector<64x128xf32>
    %177 = arith.addf %173, %176 : vector<64x128xf32>
    %178 = vector.extract_strided_slice %102 {offsets = [2, 0], sizes = [1, 128], strides = [1, 1]} : vector<9x128xf32> to vector<1x128xf32>
    %179 = vector.broadcast %178 : vector<1x128xf32> to vector<64x128xf32>
    %180 = arith.mulf %129, %179 : vector<64x128xf32>
    %181 = arith.addf %177, %180 : vector<64x128xf32>
    %182 = vector.extract_strided_slice %102 {offsets = [3, 0], sizes = [1, 128], strides = [1, 1]} : vector<9x128xf32> to vector<1x128xf32>
    %183 = vector.broadcast %182 : vector<1x128xf32> to vector<64x128xf32>
    %184 = arith.mulf %136, %183 : vector<64x128xf32>
    %185 = arith.addf %181, %184 : vector<64x128xf32>
    %186 = vector.extract_strided_slice %102 {offsets = [4, 0], sizes = [1, 128], strides = [1, 1]} : vector<9x128xf32> to vector<1x128xf32>
    %187 = vector.broadcast %186 : vector<1x128xf32> to vector<64x128xf32>
    %188 = arith.mulf %96, %187 : vector<64x128xf32>
    %189 = arith.addf %185, %188 : vector<64x128xf32>
    %190 = vector.extract_strided_slice %102 {offsets = [5, 0], sizes = [1, 128], strides = [1, 1]} : vector<9x128xf32> to vector<1x128xf32>
    %191 = vector.broadcast %190 : vector<1x128xf32> to vector<64x128xf32>
    %192 = arith.mulf %143, %191 : vector<64x128xf32>
    %193 = arith.addf %189, %192 : vector<64x128xf32>
    %194 = vector.extract_strided_slice %102 {offsets = [6, 0], sizes = [1, 128], strides = [1, 1]} : vector<9x128xf32> to vector<1x128xf32>
    %195 = vector.broadcast %194 : vector<1x128xf32> to vector<64x128xf32>
    %196 = arith.mulf %153, %195 : vector<64x128xf32>
    %197 = arith.addf %193, %196 : vector<64x128xf32>
    %198 = vector.extract_strided_slice %102 {offsets = [7, 0], sizes = [1, 128], strides = [1, 1]} : vector<9x128xf32> to vector<1x128xf32>
    %199 = vector.broadcast %198 : vector<1x128xf32> to vector<64x128xf32>
    %200 = arith.mulf %160, %199 : vector<64x128xf32>
    %201 = arith.addf %197, %200 : vector<64x128xf32>
    %202 = vector.extract_strided_slice %102 {offsets = [8, 0], sizes = [1, 128], strides = [1, 1]} : vector<9x128xf32> to vector<1x128xf32>
    %203 = vector.broadcast %202 : vector<1x128xf32> to vector<64x128xf32>
    %204 = arith.mulf %170, %203 : vector<64x128xf32>
    %205 = arith.addf %201, %204 : vector<64x128xf32>
    %206 = vector.shape_cast %205 : vector<64x128xf32> to vector<8x8x128xf32>
    %cst_70 = arith.constant dense<0.000000e+00> : vector<8x8xf32>
    %207 = vector.multi_reduction <add>, %206, %cst_70 [2] : vector<8x8x128xf32> to vector<8x8xf32>
    %c0_71 = arith.constant 0 : index
    %c0_72 = arith.constant 0 : index
    %208 = vector.load %arg8[%c0_71, %c0_72] : memref<8x16xf32, #tpu.memory_space<vmem>>, vector<8x16xf32>
    %cst_73 = arith.constant dense<0.000000e+00> : vector<8x16xf32>
    %209 = tpu.matmul %207, %208, %cst_73 {dimension_numbers = #tpu.dot_dimension_numbers<[1], [0], [0], [1], [0, 0, 1, 1], [], []>} : vector<8x8xf32>, vector<8x16xf32>, vector<8x16xf32> -> vector<8x16xf32>
    %c0_74 = arith.constant 0 : index
    %c0_75 = arith.constant 0 : index
    %210 = vector.load %arg7[%c0_74, %c0_75] : memref<16x8xf32, #tpu.memory_space<vmem>>, vector<16x8xf32>
    %cst_76 = arith.constant dense<0.000000e+00> : vector<16x16xf32>
    %211 = tpu.matmul %210, %209, %cst_76 {dimension_numbers = #tpu.dot_dimension_numbers<[1], [0], [0], [1], [0, 0, 1, 1], [], []>} : vector<16x8xf32>, vector<8x16xf32>, vector<16x16xf32> -> vector<16x16xf32>
    %c0_77 = arith.constant 0 : index
    %c0_78 = arith.constant 0 : index
    %c0_79 = arith.constant 0 : index
    %212 = vector.load %arg6[%c0_77, %c0_78, %c0_79] : memref<1x1x1xf32, #tpu.memory_space<vmem>>, vector<1x1x1xf32>
    %213 = vector.shape_cast %212 : vector<1x1x1xf32> to vector<1x1xf32>
    %214 = vector.broadcast %213 : vector<1x1xf32> to vector<16x16xf32>
    %215 = arith.addf %211, %214 : vector<16x16xf32>
    %216 = vector.shape_cast %215 : vector<16x16xf32> to vector<1x16x16xf32>
    %c0_80 = arith.constant 0 : index
    %c0_81 = arith.constant 0 : index
    %c0_82 = arith.constant 0 : index
    %217 = vector.load %arg10[%c0_80, %c0_81, %c0_82] : memref<1x16x16xf32, #tpu.memory_space<vmem>>, vector<1x16x16xf32>
    tpu.vector_store %arg10[%c0_80, %c0_81, %c0_82], %216 {strides = array<i32>} : memref<1x16x16xf32, #tpu.memory_space<vmem>>, vector<1x16x16xf32>,
    return
  }
  func.func @transform_0(%arg0: i32, %arg1: i32) -> (i32, i32, i32, i32) {
    %c0_i32 = arith.constant 0 : i32
    %c0_i32_0 = arith.constant 0 : i32
    %c0_i32_1 = arith.constant 0 : i32
    %c0_i32_2 = arith.constant 0 : i32
    return %arg0, %c0_i32, %c0_i32_0, %c0_i32_1 : i32, i32, i32, i32
  }
  func.func @transform_1(%arg0: i32, %arg1: i32) -> (i32, i32, i32) {
    %c0_i32 = arith.constant 0 : i32
    %c0_i32_0 = arith.constant 0 : i32
    %c0_i32_1 = arith.constant 0 : i32
    return %arg1, %c0_i32, %c0_i32_0 : i32, i32, i32
  }
  func.func @transform_2(%arg0: i32, %arg1: i32) -> (i32, i32, i32) {
    %c0_i32 = arith.constant 0 : i32
    %c0_i32_0 = arith.constant 0 : i32
    %c0_i32_1 = arith.constant 0 : i32
    return %arg1, %c0_i32, %c0_i32_0 : i32, i32, i32
  }
  func.func @transform_3(%arg0: i32, %arg1: i32) -> (i32, i32, i32) {
    %c0_i32 = arith.constant 0 : i32
    %c0_i32_0 = arith.constant 0 : i32
    %c0_i32_1 = arith.constant 0 : i32
    return %arg1, %c0_i32, %c0_i32_0 : i32, i32, i32
  }
  func.func @transform_4(%arg0: i32, %arg1: i32) -> (i32, i32, i32) {
    %c0_i32 = arith.constant 0 : i32
    %c0_i32_0 = arith.constant 0 : i32
    %c0_i32_1 = arith.constant 0 : i32
    return %arg1, %c0_i32, %c0_i32_0 : i32, i32, i32
  }
  func.func @transform_5(%arg0: i32, %arg1: i32) -> (i32, i32) {
    %c0_i32 = arith.constant 0 : i32
    %c0_i32_0 = arith.constant 0 : i32
    %c0_i32_1 = arith.constant 0 : i32
    return %c0_i32, %c0_i32_0 : i32, i32
  }
  func.func @transform_6(%arg0: i32, %arg1: i32) -> (i32, i32) {
    %c0_i32 = arith.constant 0 : i32
    %c0_i32_0 = arith.constant 0 : i32
    %c0_i32_1 = arith.constant 0 : i32
    return %c0_i32, %c0_i32_0 : i32, i32
  }
  func.func @transform_7(%arg0: i32, %arg1: i32) -> (i32, i32, i32, i32) {
    %c2_i32 = arith.constant 2 : i32
    %0 = arith.muli %arg1, %c2_i32 : i32
    %1 = arith.addi %0, %arg0 : i32
    %c0_i32 = arith.constant 0 : i32
    %c0_i32_0 = arith.constant 0 : i32
    %c0_i32_1 = arith.constant 0 : i32
    %c0_i32_2 = arith.constant 0 : i32
    return %1, %c0_i32, %c0_i32_0, %c0_i32_1 : i32, i32, i32, i32
  }
  func.func @transform_8(%arg0: i32, %arg1: i32) -> (i32, i32, i32) {
    %c2_i32 = arith.constant 2 : i32
    %0 = arith.muli %arg1, %c2_i32 : i32
    %1 = arith.addi %0, %arg0 : i32
    %c0_i32 = arith.constant 0 : i32
    %c0_i32_0 = arith.constant 0 : i32
    %c0_i32_1 = arith.constant 0 : i32
    return %1, %c0_i32, %c0_i32_0 : i32, i32, i32
  }
}

</mosaic_0001>

<bundles_post_ra>
// kernel: edge_extraction_forward.1
= control target key start
LH: loop header
LB: loop body
LE: loop exit
PB: predicated region body
PF: predicated region fallthrough
CT: control target
= control target key end

     0   :  { %s4736_s0 = inlined_call_operand.hbm [shape: bf16[2,8,8,128], index: 0, kind: input, shape index: {}]   ;;  %s4737_s1 = inlined_call_operand.hbm [shape: bf16[2,1152,128], index: 1, kind: input, shape index: {}]   ;;  %s4738_s2 = inlined_call_operand.hbm [shape: f32[2,1,128], index: 2, kind: input, shape index: {}]   ;;  %s4739_s3 = inlined_call_operand.hbm [shape: f32[2,9,128], index: 3, kind: input, shape index: {}]   ;;  %s4740_s4 = inlined_call_operand.hbm [shape: f32[2,1,1], index: 4, kind: input, shape index: {}]   ;;  %s4741_s5 = inlined_call_operand.hbm [shape: f32[16,8], index: 5, kind: input, shape index: {}]   ;;  %s4742_s6 = inlined_call_operand.hbm [shape: f32[8,16], index: 6, kind: input, shape index: {}]   ;;  %s4743_s7 = inlined_call_operand.hbm [shape: bf16[4,8,8,128], index: 7, kind: output, shape index: {0}]   ;;  %s4744_s8 = inlined_call_operand.hbm [shape: f32[4,16,16], index: 8, kind: output, shape index: {1}]  }
   0x1   :  { %4784 = sst [smem:[#allocation39_spill]] %s4737_s1 }
   0x2   :  { %4785 = sst [smem:[#allocation40_spill]] %s4739_s3 }
   0x3   :  { %4786 = sst [smem:[#allocation41_spill]] %s4740_s4 }
   0x4   :  { %4787 = sst [smem:[#allocation42_spill]] %s4741_s5 }
   0x5   :  { %4788 = sst [smem:[#allocation43_spill]] %s4742_s6 }
   0x6   :  { %4789 = sst [smem:[#allocation44_spill]] %s4743_s7 }
   0x7   :  { %4790 = sst [smem:[#allocation45_spill]] %s4744_s8 }
   0x8   :  { %14 = vsyncpa [#allocation4], 0 }
   0x9   :  { %16 = vsyncpa [#allocation4 + $0x1], 0 }
   0xa   :  { %17 = vsyncpa [#allocation7], 0 }
   0xb   :  { %19 = vsyncpa [#allocation7 + $0x1], 0 }
   0xc   :  { %20 = vsyncpa [#allocation10], 0 }
   0xd   :  { %22 = vsyncpa [#allocation10 + $0x1], 0 }
   0xe   :  { %23 = vsyncpa [#allocation13], 0 }
   0xf   :  { %24 = vsyncpa [#allocation5], 0 }
  0x10   :  { %26 = vsyncpa [#allocation5 + $0x1], 0 }
  0x11   :  { %27 = vsyncpa [#allocation17], 0 }
  0x12   :  { %29 = vsyncpa [#allocation17 + $0x1], 0  ;;  %s3557_s27 = smov 0   ;;  %s3559_s28 = smov 0  }
  0x13   :  { %s3561_s29 = smov 0   ;;  %s3563_s30 = smov 0  }
  0x14   :  { %s3565_s9 = smov 0   ;;  %s3567_s10 = smov 0  }
  0x15   :  { %s3569_s11 = smov 0   ;;  %s3571_s12 = smov 0  }
  0x16   :  { %s3573_s13 = smov 0   ;;  %s3575_s14 = smov 0  }
  0x17   :  { %s3577_s15 = smov 0   ;;  %s3579_s16 = smov 0  }
  0x18   :  { %s3581_s17 = smov 0   ;;  %s3583_s18 = smov 0  }
  0x19 LB: > { %4791 = sst [smem:[#allocation24_spill]] %s3437_s27  ;;  %s3624_s19 = sadd.s32 4294967295, %s3489_s18   ;;  %s3489_s18 = sphi %s3583_s18, %s35_s18   ;;  %s3485_s17 = sphi %s3581_s17, %s4886_s17   ;;  %s3481_s16 = sphi %s3579_s16, %s4885_s16   ;;  %s3477_s15 = sphi %s3577_s15, %s4884_s15   ;;  %s3473_s14 = sphi %s3575_s14, %s4883_s14   ;;  %s3469_s13 = sphi %s3573_s13, %s4882_s13   ;;  %s3465_s12 = sphi %s3571_s12, %s4881_s12   ;;  %s3461_s11 = sphi %s3569_s11, %s4874_s11   ;;  %s3457_s10 = sphi %s3567_s10, %s4873_s10   ;;  %s3453_s9 = sphi %s3565_s9, %s4880_s9   ;;  %s3449_s30 = sphi %s3563_s30, %s4871_s30   ;;  %s3445_s29 = sphi %s3561_s29, %s4879_s29   ;;  %s3441_s28 = sphi %s3559_s28, %s4878_s28   ;;  %s3437_s27 = sphi %s3557_s27, %s4877_s27  }
  0x1a   : > { %4792 = sst [smem:[#allocation25_spill]] %s3441_s28  ;;  %s2356_s20 = sadd.s32 4294967294, %s3489_s18  }
  0x1b   : > { %4793 = sst [smem:[#allocation26_spill]] %s3453_s9  ;;  %p67_p0 = scmp.ne.s32.totalorder %s3465_s12, %s3461_s11 }
  0x1c   : > { %4794 = sst [smem:[#allocation27_spill]] %s3457_s10  ;;  %p4751_p1 = scmp.eq.s32.totalorder %s3624_s19, 0 }
  0x1d   : > { %4795 = sst [smem:[#allocation28_spill]] %s3465_s12  ;;  %p93_p2 = scmp.ne.s32.totalorder %s3453_s9, %s3449_s30 }
  0x1e   : > { %4796 = sst [smem:[#allocation29_spill]] %s3473_s14  ;;  %p3633_p3 = por %p4751_p1, %p67_p0 }
  0x1f   : > { %4797 = sst [smem:[#allocation30_spill]] %s3477_s15  ;;  %p240_p4 = scmp.ne.s32.totalorder %s3445_s29, %s3441_s28 }
  0x20   : > { %4798 = sst [smem:[#allocation31_spill]] %s3624_s19  ;;  %p3641_p5 = por %p93_p2, %p4751_p1 }
  0x21   : > { %s4799_s22 = scalar_select %p3633_p3, 1, 0 }
  0x22   : > { %s4801_s23 = scalar_select %p3641_p5, 1, 0 }
  0x23   : > { %4800 = sst [smem:[#allocation32_spill]] %s4799_s22  ;;  %p241_p6 = scmp.eq.s32.totalorder %s3624_s19, 3 }
  0x24   : > { %4802 = sst [smem:[#allocation33_spill]] %s4801_s23  ;;  %p246_p7 = scmp.ne.s32.totalorder %s3441_s28, %s3437_s27 }
  0x25   : > { %p247_p8 = scmp.eq.s32.totalorder %s2356_s20, 3  ;;  %p3648_p9 = por %p241_p6, %p240_p4 }
  0x26   : > { %p2361_p10 = scmp.ge.s32.totalorder %s3489_s18, 1  ;;  %p284_p12 = scmp.lt.s32.totalorder %s3489_s18, 5 }
  0x27   : > { %s4803_s24 = scalar_select %p3648_p9, 1, 0 }
  0x28   : > { %p3653_p11 = por %p247_p8, %p246_p7  ;;  %p3658_p13 = pnand %p2361_p10, %p284_p12 }
  0x29   : > { %4804 = sst [smem:[#allocation34_spill]] %s4803_s24  ;;  %s3491_s30 = smov [#allocation12]  }
  0x2a   : > { %s4805_s25 = scalar_select %p3653_p11, 1, 0 }
  0x2b   : > { %s4807_s26 = scalar_select %p3658_p13, 1, 0 }
  0x2c   : > { %4806 = sst [smem:[#allocation35_spill]] %s4805_s25  ;;  %s296_s11 = sshll.u32 %s3491_s30, 4  ;;  %s297_s11 = int_to_ptr.vmem [resolvable:$true] %s296_s11 }
  0x2d   : > { %4808 = sst [smem:[#allocation36_spill]] %s4807_s26  ;;  %p2851_p0 = pneg %p3658_p13 }
  0x2e   : > { %s44_s21 = sadd.s32 1, %s3481_s16  ;;  %s4810_s5 = sld [smem:[#allocation42_spill]] }
  0x2f   : > { %p3666_p2 = pnand %p2851_p0, %p4751_p1 }
  0x31   : > { %s4809_s20 = scalar_select %p3666_p2, 1, 0 }
  0x32   : > { %p4766_p6 = pneg %p3666_p2 }
  0x34   : > { %s3093_s8 = scalar_lea.hbm %s4810_s5, 256 }
  0x35   : > { %p3094_p4 = scmp.ne.s32.totalorder %s4810_s5, %s3093_s8  ;;  %p3100_p10 = scmp.lt.u32.totalorder %s3093_s8, %s4810_s5 }
  0x37   : > { %p3096_p7 = pnand %p4766_p6, %p3094_p4 }
  0x39   : > { %p3097_p8 = pneg %p3096_p7 }
  0x3b   : > { %p3102_p12 = pnand %p3100_p10, %p3097_p8 }
  0x3d   : > { %3105 = shalt.err (!%p3102_p12)
}
  0x3e   : > { %s3106_s14 = scalar_lea.vmem %s297_s11, 256  ;;  %p3114_p9 = scmp.lt.s32.totalorder %s297_s11, %s297_s11 }
  0x3f   : > { %p3107_p0 = scmp.ne.s32.totalorder %s297_s11, %s3106_s14  ;;  %p3115_p5 = scmp.lt.s32.totalorder %s3106_s14, %s3106_s14 }
  0x41   : > { %p3109_p1 = pnand %p3107_p0, %p4766_p6  ;;  %p3116_p3 = por %p3115_p5, %p3114_p9 }
  0x43   : > { %p3110_p11 = pneg %p3109_p1 }
  0x45   : > { %p3117_p13 = pnand %p3116_p3, %p3110_p11 }
  0x47   : > { %3120 = shalt.err (!%p3117_p13)
}
  0x48   : > { %s4756_s7 = smov 128   ;;  %s4757_s8 = smov 8  }
  0x49   : > { %2854 = dma.hbm_to_vmem [thread:$0]  (!%p3666_p2), %s4810_s5, 256, %s297_s11, [#allocation13], %s4756_s7, %s4756_s7, %s4757_s8  }
  0x4a   : > { %p3696_p1 = scmp.ge.s32.totalorder %s44_s21, 2  ;;  %p4764_p3 = scmp.eq.s32.totalorder %s3489_s18, 0 }
  0x4b   : > { %s80_s24 = sadd.s32 1, %s3457_s10  ;;  %p87_p5 = scmp.ne.s32.totalorder %s3457_s10, %s3453_s9 }
  0x4c   : > { %s4811_s15 = scalar_select %p3696_p1, 1, 0 }
  0x4d   : > { %s4888_s21 = smov (%p3696_p1, %s44_s21), 0  ;;  %p89_p9 = por %p87_p5, %p4764_p3 }
  0x4e   : > { %4812 = sst [smem:[#allocation37_spill]] %s4888_s21  ;;  %p4763_p11 = scmp.lt.s32.totalorder %s3489_s18, 4 }
  0x4f   : > { %s77_s25 = ssub.s32 %s3481_s16, %s4888_s21  ;;  %s4765_s30 = sand.u32 1, %s3489_s18  }
  0x50   : > { %p78_p13 = scmp.eq.s32.totalorder %s77_s25, 0  ;;  %s3715_s11 = sand.u32 1, %s3457_s10  }
  0x51   : > { %s2826_s14 = smul.u32 576, %s3715_s11  ;;  %p3724_p4 = pnand %p4763_p11, %p89_p9 }
  0x52   : > { %s3718_s27 = scalar_select %p78_p13, %s3457_s10, %s80_s24  }
  0x53   : > { %s2827_s7 = smul.u32 9216, %s3481_s16  ;;  %s4815_s1 = sld [smem:[#allocation39_spill]] }
  0x54   : > { %4813 = sst [smem:[#allocation38_spill]] %s3718_s27  ;;  %s346_s25 = scalar_lea.vmem [#allocation6], %s2826_s14 }
  0x55   : > { %s4814_s8 = scalar_select %p3724_p4, 1, 0 }
  0x56   : > { %s353_s24 = sshll.u32 %s346_s25, 4  ;;  %s3737_s27 = scalar_lea.sflag [#allocation7], %s4765_s30  ;;  %s3733_s24 = int_to_ptr.vmem [resolvable:$true] %s353_s24 }
  0x57   : > { %p3743_p8 = pneg %p3724_p4 }
  0x59   : > { %s3731_s23 = scalar_lea.hbm %s4815_s1, %s2827_s7  ;;  %s3126_s7 = scalar_lea.hbm %s4815_s1, 18432 }
  0x5a   : > { %s3121_s10 = scalar_lea.hbm %s3731_s23, 9216  ;;  %p3127_p0 = scmp.lt.u32.totalorder %s3731_s23, %s4815_s1 }
  0x5b   : > { %p3122_p7 = scmp.ne.s32.totalorder %s3731_s23, %s3121_s10  ;;  %p3128_p5 = scmp.lt.u32.totalorder %s3126_s7, %s3121_s10 }
  0x5c   : > { %s4816_s9 = scalar_select %p3743_p8, 1, 0 }
  0x5d   : > { %p3124_p10 = pnand %p3743_p8, %p3122_p7  ;;  %p3129_p9 = por %p3128_p5, %p3127_p0 }
  0x5e   : > { %p3130_p13 = scmp.lt.u32.totalorder %s3121_s10, %s3731_s23 }
  0x5f   : > { %p3125_p12 = pneg %p3124_p10 }
  0x60   : > { %p3131_p11 = por %p3130_p13, %p3129_p9 }
  0x62   : > { %p3132_p3 = pnand %p3131_p11, %p3125_p12 }
  0x64   : > { %3135 = shalt.err (!%p3132_p3)
}
  0x65   : > { %s3136_s30 = scalar_lea.vmem %s3733_s24, 9216  ;;  %s3494_s5 = smov [#allocation6]  }
  0x66   : > { %p3137_p7 = scmp.ne.s32.totalorder %s3733_s24, %s3136_s30  ;;  %s3141_s28 = sshll.u32 %s3494_s5, 4  ;;  %s3142_s28 = int_to_ptr.vmem [resolvable:$false] %s3141_s28 }
  0x67   : > { %s3143_s14 = scalar_lea.vmem %s3142_s28, 18432  ;;  %p3144_p1 = scmp.lt.s32.totalorder %s3733_s24, %s3142_s28 }
  0x68   : > { %p3139_p10 = pnand %p3137_p7, %p3743_p8  ;;  %p3145_p2 = scmp.lt.s32.totalorder %s3143_s14, %s3136_s30 }
  0x6a   : > { %p3140_p6 = pneg %p3139_p10  ;;  %p3146_p0 = por %p3145_p2, %p3144_p1 }
  0x6c   : > { %p3147_p5 = pnand %p3146_p0, %p3140_p6 }
  0x6e   : > { %3150 = shalt.err (!%p3147_p5)
}
  0x6f   : > { %s4776_s10 = smov 64   ;;  %s4781_s7 = smov 4  }
  0x70   : > { %2864 = dma.hbm_to_vmem [thread:$0]  (!%p3724_p4), %s3731_s23, 9216, %s3733_s24, %s3737_s27, %s4776_s10, %s4776_s10, %s4781_s7  }
  0x71   : > { %s2370_s25 = sshll.u32 %s3715_s11, 4  ;;  %s2558_s30 = sshll.u32 %s3481_s16, 8 }
  0x72   : > { %s4817_s3 = sld [smem:[#allocation40_spill]]  ;;  %s384_s1 = scalar_lea.vmem [#allocation9], %s2370_s25 }
  0x73   : > { %s391_s19 = sshll.u32 %s384_s1, 4  ;;  %s3497_s22 = smov [#allocation14]   ;;  %s3777_s19 = int_to_ptr.vmem [resolvable:$true] %s391_s19 }
  0x74   : > { %s3779_s26 = sshll.u32 %s3497_s22, 4  ;;  %s4818_s4 = sand.u32 1, %s3489_s18   ;;  %s311_s26 = int_to_ptr.vmem [resolvable:$true] %s3779_s26 }
  0x75   : > { %s3783_s23 = scalar_lea.sflag [#allocation10], %s4818_s4 }
  0x78   : > { %s3775_s14 = scalar_lea.hbm %s4817_s3, %s2558_s30  ;;  %s3156_s28 = scalar_lea.hbm %s4817_s3, 512 }
  0x79   : > { %s3151_s24 = scalar_lea.hbm %s3775_s14, 256  ;;  %p3157_p3 = scmp.lt.u32.totalorder %s3775_s14, %s4817_s3 }
  0x7a   : > { %p3152_p2 = scmp.ne.s32.totalorder %s3775_s14, %s3151_s24  ;;  %p3158_p11 = scmp.lt.u32.totalorder %s3156_s28, %s3151_s24 }
  0x7b   : > { %p3160_p9 = scmp.lt.u32.totalorder %s3151_s24, %s3775_s14 }
  0x7c   : > { %p3154_p6 = pnand %p3152_p2, %p3743_p8  ;;  %p3159_p12 = por %p3158_p11, %p3157_p3 }
  0x7e   : > { %p3155_p1 = pneg %p3154_p6  ;;  %p3161_p13 = por %p3160_p9, %p3159_p12 }
  0x80   : > { %p3162_p7 = pnand %p3161_p13, %p3155_p1 }
  0x82   : > { %3165 = shalt.err (!%p3162_p7)
}
  0x83   : > { %s3166_s1 = scalar_lea.vmem %s3777_s19, 256  ;;  %s3498_s4 = smov [#allocation9]  }
  0x84   : > { %p3167_p10 = scmp.ne.s32.totalorder %s3777_s19, %s3166_s1  ;;  %s3171_s22 = sshll.u32 %s3498_s4, 4  ;;  %s3172_s22 = int_to_ptr.vmem [resolvable:$false] %s3171_s22 }
  0x85   : > { %s3173_s10 = scalar_lea.vmem %s3172_s22, 512  ;;  %p3174_p2 = scmp.lt.s32.totalorder %s3777_s19, %s3172_s22 }
  0x86   : > { %p3169_p0 = pnand %p3167_p10, %p3743_p8  ;;  %p3175_p6 = scmp.lt.s32.totalorder %s3173_s10, %s3166_s1 }
  0x88   : > { %p3170_p5 = pneg %p3169_p0  ;;  %p3176_p3 = por %p3175_p6, %p3174_p2 }
  0x8a   : > { %p3177_p11 = pnand %p3176_p3, %p3170_p5 }
  0x8c   : > { %3180 = shalt.err (!%p3177_p11)
}
  0x8d   : > { %s4819_s24 = smov 8   ;;  %s4820_s30 = smov 128  }
  0x8e   : > { %2870 = dma.hbm_to_vmem [thread:$0]  (!%p3724_p4), %s3775_s14, 256, %s3777_s19, %s3783_s23, %s4820_s30, %s4820_s30, %s4819_s24  }
  0x8f   : > { %s4821_s6 = sld [smem:[#allocation43_spill]]  ;;  %p4822_p12 = scmp.ne.s32.totalorder %s4809_s20, 0 }
  0x91   : > { %p4823_p9 = pneg %p4822_p12 }
  0x95   : > { %s3181_s25 = scalar_lea.hbm %s4821_s6, 128 }
  0x96   : > { %p3182_p1 = scmp.ne.s32.totalorder %s4821_s6, %s3181_s25  ;;  %p3188_p10 = scmp.lt.u32.totalorder %s3181_s25, %s4821_s6 }
  0x98   : > { %p3184_p13 = pnand %p3182_p1, %p4823_p9 }
  0x9a   : > { %p3185_p7 = pneg %p3184_p13 }
  0x9c   : > { %p3190_p0 = pnand %p3188_p10, %p3185_p7 }
  0x9e   : > { %3193 = shalt.err (!%p3190_p0)
}
  0x9f   : > { %s3194_s19 = scalar_lea.vmem %s311_s26, 128  ;;  %p4824_p2 = pmov %p4823_p9 }
  0xa0   : > { %p3195_p5 = scmp.ne.s32.totalorder %s311_s26, %s3194_s19  ;;  %p3202_p11 = scmp.lt.s32.totalorder %s311_s26, %s311_s26 }
  0xa1   : > { %p3203_p4 = scmp.lt.s32.totalorder %s3194_s19, %s3194_s19 }
  0xa2   : > { %p3197_p6 = pnand %p3195_p5, %p4824_p2 }
  0xa3   : > { %p3204_p8 = por %p3203_p4, %p3202_p11 }
  0xa4   : > { %p3198_p3 = pneg %p3197_p6 }
  0xa6   : > { %p3205_p1 = pnand %p3204_p8, %p3198_p3 }
  0xa8   : > { %3208 = shalt.err (!%p3205_p1)
}
  0xa9   : > { %2857 = dma.hbm_to_vmem [thread:$0]  (!%p4822_p12), %s4821_s6, 128, %s311_s26, [#allocation13]  }
  0xaa   : > { %s54_s30 = sadd.s32 1, %s3469_s13  ;;  %s47_s5 = sadd.s32 1, %s3485_s17 }
  0xab   : > { %p61_p4 = scmp.ne.s32.totalorder %s3469_s13, %s3465_s12  ;;  %p4825_p8 = scmp.ne.s32.totalorder %s4811_s15, 0 }
  0xac   : > { %p4826_p9 = scmp.eq.s32.totalorder %s3489_s18, 0  ;;  %s2357_s28 = sshll.u32 %s3481_s16, 1 }
  0xad   : > { %s4890_s5 = smov (!%p4825_p8, %s47_s5), %s3485_s17  ;;  %s224_s25 = sadd.s32 %s3485_s17, %s2357_s28 }
  0xae   : > { %p3840_p13 = por %p4826_p9, %p61_p4  ;;  %p49_p7 = scmp.ge.s32.totalorder %s4890_s5, 2 }
  0xaf   : > { %s2358_s1 = sshll.u32 %s4888_s21, 1  ;;  %s321_s26 = sand.u32 1, %s3469_s13  }
  0xb0   : > { %s4892_s5 = smov (%p49_p7, %s4890_s5), 0  ;;  %s2365_s15 = sshll.u32 %s321_s26, 5 }
  0xb1   : > { %s51_s4 = ssub.s32 %s3485_s17, %s4892_s5  ;;  %s226_s22 = sadd.s32 %s2358_s1, %s4892_s5 }
  0xb2   : > { %p52_p12 = scmp.eq.s32.totalorder %s51_s4, 0  ;;  %s227_s10 = ssub.s32 %s224_s25, %s226_s22 }
  0xb3   : > { %p228_p10 = scmp.eq.s32.totalorder %s227_s10, 0  ;;  %s4828_s14 = sadd.s32 1, %s3445_s29 }
  0xb4   : > { %s3854_s19 = scalar_select %p52_p12, %s3469_s13, %s54_s30  }
  0xb5   : > { %s3859_s24 = scalar_select %p228_p10, %s3445_s29, %s4828_s14  }
  0xb6   : > { %s2557_s28 = sshll.u32 %s3485_s17, 9  ;;  %s325_s7 = scalar_lea.vmem [#allocation3], %s2365_s15 }
  0xb7   : > { %s332_s3 = sshll.u32 %s325_s7, 4  ;;  %s3865_s12 = scalar_lea.hbm %s4736_s0, %s2557_s28  ;;  %s3867_s3 = int_to_ptr.vmem [resolvable:$true] %s332_s3 }
  0xb8   : > { %p4829_p0 = scmp.lt.s32.totalorder %s3489_s18, 4  ;;  %s2369_s7 = sshll.u32 %s3481_s16, 4 }
  0xb9   : > { %s366_s25 = scalar_lea.vmem [#allocation8], %s3715_s11  ;;  %s3886_s15 = scalar_lea.hbm %s4738_s2, %s2369_s7 }
  0xba   : > { %p3873_p5 = pnand %p4829_p0, %p3840_p13  ;;  %s3879_s1 = sshll.u32 %s366_s25, 4  ;;  %s374_s1 = int_to_ptr.vmem [resolvable:$true] %s3879_s1 }
  0xbb   : > { %s3888_s4 = scalar_lea.sflag [#allocation4], %s321_s26  ;;  %s3209_s20 = scalar_lea.hbm %s3865_s12, 512 }
  0xbc   : > { %p3210_p2 = scmp.ne.s32.totalorder %s3865_s12, %s3209_s20  ;;  %p3211_p6 = pneg %p3873_p5 }
  0xbd   : > { %s3214_s14 = scalar_lea.hbm %s4736_s0, 1024  ;;  %p3215_p1 = scmp.lt.u32.totalorder %s3865_s12, %s4736_s0 }
  0xbe   : > { %p3212_p3 = pnand %p3211_p6, %p3210_p2  ;;  %p3216_p4 = scmp.lt.u32.totalorder %s3214_s14, %s3209_s20 }
  0xbf   : > { %p3218_p9 = scmp.lt.u32.totalorder %s3209_s20, %s3865_s12 }
  0xc0   : > { %p3213_p11 = pneg %p3212_p3  ;;  %p3217_p8 = por %p3216_p4, %p3215_p1 }
  0xc2   : > { %p3219_p13 = por %p3218_p9, %p3217_p8 }
  0xc4   : > { %p3220_p7 = pnand %p3219_p13, %p3213_p11 }
  0xc6   : > { %3223 = shalt.err (!%p3220_p7)
}
  0xc7   : > { %s3224_s26 = scalar_lea.vmem %s3867_s3, 512  ;;  %s3499_s6 = smov [#allocation3]  }
  0xc8   : > { %p3225_p12 = scmp.ne.s32.totalorder %s3867_s3, %s3224_s26  ;;  %s3229_s21 = sshll.u32 %s3499_s6, 4  ;;  %s3230_s21 = int_to_ptr.vmem [resolvable:$false] %s3229_s21 }
  0xc9   : > { %s3231_s22 = scalar_lea.vmem %s3230_s21, 1024  ;;  %p3232_p2 = scmp.lt.s32.totalorder %s3867_s3, %s3230_s21 }
  0xca   : > { %p3227_p10 = pnand %p3225_p12, %p3211_p6  ;;  %p3233_p3 = scmp.lt.s32.totalorder %s3231_s22, %s3224_s26 }
  0xcc   : > { %p3228_p0 = pneg %p3227_p10  ;;  %p3234_p1 = por %p3233_p3, %p3232_p2 }
  0xce   : > { %p3235_p4 = pnand %p3234_p1, %p3228_p0 }
  0xd0   : > { %3238 = shalt.err (!%p3235_p4)
}
  0xd1   : > { %s4831_s20 = smov 4   ;;  %s4832_s10 = smov 64  }
  0xd2   : > { %2861 = dma.hbm_to_vmem [thread:$0]  (!%p3873_p5), %s3865_s12, 512, %s3867_s3, %s3888_s4, %s4832_s10, %s4832_s10, %s4831_s20  }
  0xd3   : > { %s3239_s14 = scalar_lea.hbm %s3886_s15, 16  ;;  %p4833_p11 = scmp.ne.s32.totalorder %s4816_s9, 0 }
  0xd4   : > { %p3240_p6 = scmp.ne.s32.totalorder %s3886_s15, %s3239_s14  ;;  %s3244_s25 = scalar_lea.hbm %s4738_s2, 32 }
  0xd5   : > { %p3245_p13 = scmp.lt.u32.totalorder %s3886_s15, %s4738_s2  ;;  %p3246_p7 = scmp.lt.u32.totalorder %s3244_s25, %s3239_s14 }
  0xd6   : > { %p3242_p8 = pnand %p3240_p6, %p4833_p11  ;;  %p3248_p10 = scmp.lt.u32.totalorder %s3239_s14, %s3886_s15 }
  0xd7   : > { %p3247_p12 = por %p3246_p7, %p3245_p13 }
  0xd8   : > { %p3243_p9 = pneg %p3242_p8 }
  0xd9   : > { %p3249_p0 = por %p3248_p10, %p3247_p12 }
  0xdb   : > { %p3250_p2 = pnand %p3249_p0, %p3243_p9 }
  0xdd   : > { %3253 = shalt.err (!%p3250_p2)
}
  0xde   : > { %s3254_s3 = scalar_lea.vmem %s374_s1, 16  ;;  %s3500_s12 = smov [#allocation8]  }
  0xdf   : > { %p3255_p5 = scmp.ne.s32.totalorder %s374_s1, %s3254_s3  ;;  %s3259_s4 = sshll.u32 %s3500_s12, 4  ;;  %s3260_s4 = int_to_ptr.vmem [resolvable:$false] %s3259_s4 }
  0xe0   : > { %s3261_s21 = scalar_lea.vmem %s3260_s4, 32  ;;  %p3262_p4 = scmp.lt.s32.totalorder %s374_s1, %s3260_s4 }
  0xe1   : > { %p3257_p3 = pnand %p3255_p5, %p4833_p11  ;;  %p3263_p6 = scmp.lt.s32.totalorder %s3261_s21, %s3254_s3 }
  0xe3   : > { %p3258_p1 = pneg %p3257_p3  ;;  %p3264_p8 = por %p3263_p6, %p3262_p4 }
  0xe5   : > { %p3265_p7 = pnand %p3264_p8, %p3258_p1 }
  0xe7   : > { %3268 = shalt.err (!%p3265_p7)
}
  0xe8   : > { %p4834_p13 = scmp.ne.s32.totalorder %s4814_s8, 0  ;;  %s4835_s10 = sld [smem:[#allocation41_spill]] }
  0xe9   : > { %s404_s30 = scalar_lea.vmem [#allocation11], %s3715_s11 }
  0xea   : > { %2867 = dma.hbm_to_vmem [thread:$0]  (!%p4834_p13), %s3886_s15, 16, %s374_s1, %s3737_s27  }
  0xeb   : > { %s411_s28 = sshll.u32 %s404_s30, 4  ;;  %s412_s28 = int_to_ptr.vmem [resolvable:$true] %s411_s28 }
  0xee   : > { %s4836_s25 = smov %s4835_s10  ;;  %s3943_s14 = scalar_lea.hbm %s4835_s10, %s2369_s7 }
  0xef   : > { %s3269_s26 = scalar_lea.hbm %s3943_s14, 16  ;;  %s3274_s1 = scalar_lea.hbm %s4836_s25, 32 }
  0xf0   : > { %p3270_p9 = scmp.ne.s32.totalorder %s3943_s14, %s3269_s26  ;;  %p3275_p0 = scmp.lt.u32.totalorder %s3943_s14, %s4836_s25 }
  0xf1   : > { %p3276_p2 = scmp.lt.u32.totalorder %s3274_s1, %s3269_s26  ;;  %p3278_p3 = scmp.lt.u32.totalorder %s3269_s26, %s3943_s14 }
  0xf2   : > { %p3272_p12 = pnand %p3270_p9, %p4833_p11 }
  0xf3   : > { %p3277_p5 = por %p3276_p2, %p3275_p0 }
  0xf4   : > { %p3273_p10 = pneg %p3272_p12 }
  0xf5   : > { %p3279_p1 = por %p3278_p3, %p3277_p5 }
  0xf7   : > { %p3280_p4 = pnand %p3279_p1, %p3273_p10 }
  0xf9   : > { %3283 = shalt.err (!%p3280_p4)
}
  0xfa   : > { %s3284_s11 = scalar_lea.vmem %s412_s28, 16  ;;  %s3501_s7 = smov [#allocation11]  }
  0xfb   : > { %p3285_p6 = scmp.ne.s32.totalorder %s412_s28, %s3284_s11  ;;  %s3289_s12 = sshll.u32 %s3501_s7, 4  ;;  %s3290_s12 = int_to_ptr.vmem [resolvable:$false] %s3289_s12 }
  0xfc   : > { %s3291_s4 = scalar_lea.vmem %s3290_s12, 32  ;;  %p3292_p9 = scmp.lt.s32.totalorder %s412_s28, %s3290_s12 }
  0xfd   : > { %p3287_p8 = pnand %p3285_p6, %p4833_p11  ;;  %p3293_p12 = scmp.lt.s32.totalorder %s3291_s4, %s3284_s11 }
  0xff   : > { %p3288_p7 = pneg %p3287_p8  ;;  %p3294_p13 = por %p3293_p12, %p3292_p9 }
 0x101   : > { %p3295_p0 = pnand %p3294_p13, %p3288_p7 }
 0x103   : > { %3298 = shalt.err (!%p3295_p0)
}
 0x104   : > { %p4837_p2 = scmp.ne.s32.totalorder %s4814_s8, 0  ;;  %s4838_s21 = sld [smem:[#allocation36_spill]] }
 0x106   : > { %2873 = dma.hbm_to_vmem [thread:$0]  (!%p4837_p2), %s3943_s14, 16, %s412_s28, %s3783_s23  }
 0x10a   : > { %p4839_p10 = scmp.ne.s32.totalorder %s4838_s21, 0 }
 0x10b   : > { %s4840_s9 = sld [smem:[#allocation28_spill]] (!%p4839_p10)  ;;  %s4841_s22 = sld [smem:[#allocation32_spill]] (!%p4839_p10) }
 0x10c   : > { %420 = sbr.rel (%p4839_p10) target bundleno = 1271 (0x4f7), region = 48 }
 0x111   : > { %s422_s20 = sand.u32 (!%p4839_p10), 1, %s4840_s9   ;;  %p4842_p11 = scmp.ne.s32.totalorder (!%p4839_p10), %s4841_s22, 0 }
 0x112   : > { %s2375_s10 = sshll.u32 (!%p4839_p10), %s422_s20, 5  ;;  %s423_s30 = scalar_lea.sflag (!%p4839_p10), [#allocation4], %s422_s20 }
 0x113   : > { %s3967_s26 = scalar_lea.vmem [#allocation3], %s2375_s10 }
 0x114   : > { %3412 = dma.done.wait (%p4842_p11), %s423_s30, 512  }
 0x115   : > { %3414 = vsyncadd (%p4842_p11), %s423_s30, 4294966784  ;;  %s4843_s6 = sld [smem:[#allocation31_spill]]  ;;  %s4845_s27 = sld [smem:[#allocation33_spill]] }
 0x116   : > { %s4844_s8 = sld [smem:[#allocation26_spill]] }
 0x11b   : > { %s431_s1 = sand.u32 1, %s4843_s6   ;;  %p4846_p13 = scmp.ne.s32.totalorder %s4845_s27, 0 }
 0x11c   : > { %s3975_s23 = sand.u32 1, %s4844_s8   ;;  %s432_s28 = scalar_lea.sflag [#allocation7], %s431_s1 }
 0x11d   : > { %s2828_s14 = smul.u32 576, %s3975_s23 }
 0x11f   : > { %s3978_s15 = scalar_lea.vmem [#allocation6], %s2828_s14 }
 0x120   : > { %3416 = dma.done.wait (%p4846_p13), %s432_s28, 9232  }
 0x121   : > { %3418 = vsyncadd (%p4846_p13), %s432_s28, 4294958064  ;;  %s2376_s3 = sshll.u32 %s3975_s23, 4  ;;  %s443_s11 = scalar_lea.vmem [#allocation8], %s3975_s23 }
 0x122   : > { %s449_s7 = scalar_lea.sflag [#allocation10], %s431_s1  ;;  %s3986_s12 = scalar_lea.vmem [#allocation9], %s2376_s3 }
 0x123   : > { %3420 = dma.done.wait (%p4846_p13), %s449_s7, 272  }
 0x124   : > { %3422 = vsyncadd (%p4846_p13), %s449_s7, 4294967024  ;;  %s460_s4 = scalar_lea.vmem [#allocation11], %s3975_s23  ;;  %p4847_p5 = scmp.eq.s32.totalorder %s4843_s6, 0 }
 0x126   : > { %3424 = dma.done.wait (%p4847_p5), [#allocation13], 384   ;;  %p4848_p3 = pmov %p4847_p5 }
 0x127   : > { %s4849_s21 = sld [smem:[#allocation25_spill]]  ;;  %s4850_s8 = sld [smem:[#allocation29_spill]] }
 0x128   : > { %3426 = vsyncadd (%p4848_p3), [#allocation13], 4294966912 }
 0x12d   : > { %s3998_s9 = sand.u32 1, %s4849_s21   ;;  %p2381_p1 = scmp.ne.s32.totalorder %s4850_s8, 0 }
 0x12e   : > { %s2379_s22 = sshll.u32 %s3998_s9, 5  ;;  %s2380_s20 = sshll.u32 %s3998_s9, 4  ;;  %v533_v0 = vld [vmem:[%s3967_s26] sm:$0xff] (!%p2381_p1)   ;;  %v535_v1 = vld [vmem:[%s3967_s26 + $0x8] sm:$0xff] (!%p2381_p1)   ;;  %v537_v2 = vld [vmem:[%s3967_s26 + $0x10] sm:$0xff] (!%p2381_p1)  }
 0x12f   : > { %s4002_s10 = scalar_lea.vmem [#allocation15], %s2379_s22  ;;  %s4004_s30 = scalar_lea.vmem [#allocation16], %s2380_s20  ;;  %541 = vst [vmem:[#allocation2] sm:$0xff] (!%p2381_p1), %v533_v0   ;;  %543 = vst [vmem:[#allocation2 + $0x8] sm:$0xff] (!%p2381_p1), %v535_v1   ;;  %v539_v3 = vld [vmem:[%s3967_s26 + $0x18] sm:$0xff] (!%p2381_p1)  }
 0x130   : > { %532 = sbr.rel (%p2381_p1) target bundleno = 311 (0x137), region = 80  ;;  %545 = vst [vmem:[#allocation2 + $0x10] sm:$0xff] (!%p2381_p1), %v537_v2   ;;  %547 = vst [vmem:[#allocation2 + $0x18] sm:$0xff] (!%p2381_p1), %v539_v3  }
 0x137 PF: > { %v3014_v4 = vld [vmem:[%s3978_s15 + $0x40] sm:$0xff]   ;;  %v3018_v8 = vld [vmem:[%s3978_s15 + $0x48] sm:$0xff]   ;;  %v3022_v12 = vld [vmem:[%s3978_s15 + $0x50] sm:$0xff]   ;;  %v565_v29 = vlaneseq  ;;  %vm3502_vm3 = vmmov 1   ;;  %v3503_v47 = vmov 0.0   ;;  %vm3504_vm10 = vmmov 0  }
 0x138   : > { %v3015_v5 = vld [vmem:[%s3978_s15] sm:$0xff]   ;;  %2615 = vmatprep.subr.bf16.mxu0 %v3014_v4  ;;  %v3019_v9 = vld [vmem:[%s3978_s15 + $0x8] sm:$0xff]   ;;  %v3023_v13 = vld [vmem:[%s3978_s15 + $0x10] sm:$0xff]   ;;  %vm1914_vm11 = vcmask 1041409   ;;  %vm1916_vm12 = vcmask 1042434   ;;  %vm1918_vm13 = vcmask 1043459  }
 0x139   : > { %v3016_v6 = vld [vmem:[%s3978_s15 + $0xc0] sm:$0xff]   ;;  %2616 = vmatpush3.bf16.msra.mxu0 %v3015_v5  ;;  %v3020_v10 = vld [vmem:[%s3978_s15 + $0xc8] sm:$0xff]   ;;  %v3024_v14 = vld [vmem:[%s3978_s15 + $0xd0] sm:$0xff]   ;;  %v4041_v34 = vshrl.u32 %v565_v29, 7  ;;  %vm1920_vm14 = vcmask 1044484   ;;  %vm1922_vm15 = vcmask 1045509  }
 0x13a   : > { %v3017_v7 = vld [vmem:[%s3978_s15 + $0x80] sm:$0xff]   ;;  %2655 = vmatprep.subr.bf16.mxu1 %v3016_v6  ;;  %2617 = vmatprep.subr.bf16.mxu0 %v3018_v8  ;;  %v3021_v11 = vld [vmem:[%s3978_s15 + $0x88] sm:$0xff]   ;;  %v3025_v15 = vld [vmem:[%s3978_s15 + $0x90] sm:$0xff]   ;;  %s4859_s26 = sld [smem:[#allocation29_spill]]  ;;  %s4860_s6 = sld [smem:[#allocation30_spill]] }
 0x13b   : > { %2656 = vmatpush3.bf16.msra.mxu1 %v3017_v7  ;;  %v3026_v16 = vld [vmem:[%s3978_s15 + $0x58] sm:$0xff]   ;;  %v3030_v20 = vld [vmem:[%s3978_s15 + $0x60] sm:$0xff]   ;;  %v3034_v24 = vld [vmem:[%s3978_s15 + $0x68] sm:$0xff]   ;;  %vm583_vm0 = vcmp.gt.s32.totalorder %v4041_v34, 0  ;;  %vm575_vm1 = vcmp.lt.s32.totalorder %v4041_v34, 1  ;;  %vm601_vm2 = vcmp.lt.s32.totalorder %v4041_v34, 7 }
 0x13c   : > { %2657 = vmatprep.subr.bf16.mxu1 %v3020_v10  ;;  %v3027_v17 = vld [vmem:[%s3978_s15 + $0x18] sm:$0xff]   ;;  %v3031_v21 = vld [vmem:[%s3978_s15 + $0x20] sm:$0xff]   ;;  %v3035_v25 = vld [vmem:[%s3978_s15 + $0x28] sm:$0xff]   ;;  %s4861_s27 = sld [smem:[#allocation34_spill]]  ;;  %s2118_s28 = sshll.u32 %s4002_s10, 4  ;;  %s4618_s28 = int_to_ptr.vmem [resolvable:$true] %s2118_s28 }
 0x13d   : > { %2618 = vmatpush3.bf16.msra.mxu0 %v3019_v9  ;;  %v3028_v18 = vld [vmem:[%s3978_s15 + $0xd8] sm:$0xff]   ;;  %v3032_v22 = vld [vmem:[%s3978_s15 + $0xe0] sm:$0xff]   ;;  %v3036_v26 = vld [vmem:[%s3978_s15 + $0xe8] sm:$0xff]   ;;  %s3299_s21 = scalar_lea.vmem %s4618_s28, 512  ;;  %s3506_s22 = smov [#allocation15]  }
 0x13e   : > { %2619 = vmatprep.subr.bf16.mxu0 %v3022_v12  ;;  %v3029_v19 = vld [vmem:[%s3978_s15 + $0x98] sm:$0xff]   ;;  %v3033_v23 = vld [vmem:[%s3978_s15 + $0xa0] sm:$0xff]   ;;  %v3037_v27 = vld [vmem:[%s3978_s15 + $0xa8] sm:$0xff]   ;;  %p3300_p4 = scmp.ne.s32.totalorder %s4618_s28, %s3299_s21  ;;  %s3303_s20 = sshll.u32 %s3506_s22, 4  ;;  %s3304_s20 = int_to_ptr.vmem [resolvable:$false] %s3303_s20 }
 0x13f   : > { %2658 = vmatpush3.bf16.msra.mxu1 %v3021_v11  ;;  %v3038_v28 = vld [vmem:[%s3978_s15 + $0x70] sm:$0xff]   ;;  %v3042_v33 = vld [vmem:[%s3978_s15 + $0x78] sm:$0xff]   ;;  %v4046_v37 = vld [vmem:[#allocation2] sm:$0xf]  ;;  %p3306_p9 = scmp.lt.s32.totalorder %s4618_s28, %s3304_s20 }
 0x140   : > { %2659 = vmatprep.subr.bf16.mxu1 %v3024_v14  ;;  %v3039_v30 = vld [vmem:[%s3978_s15 + $0x30] sm:$0xff]   ;;  %v3043_v35 = vld [vmem:[%s3978_s15 + $0x38] sm:$0xff]   ;;  %v4048_v38 = vld [vmem:[#allocation2 + $0x4] sm:$0xf]  ;;  %v4051_v39 = vunpack.c.l.bf16 %v4046_v37  ;;  %s2549_s1 = sshll.u32 %s4859_s26, 1 }
 0x141   : > { %2620 = vmatpush3.bf16.msra.mxu0 %v3023_v13  ;;  %v3040_v31 = vld [vmem:[%s3978_s15 + $0xf0] sm:$0xff]   ;;  %v3044_v36 = vld [vmem:[%s3978_s15 + $0xf8] sm:$0xff]   ;;  %v558_v42 = vunpack.c.l.bf16 %v4048_v38  ;;  %vm4065_vm4 = vmpackc.low %vm583_vm0, %vm3502_vm3  ;;  %s4614_s14 = sadd.s32 %s4860_s6, %s2549_s1 }
 0x142   : > { %2621 = vmatprep.subr.bf16.mxu0 %v3026_v16  ;;  %v3041_v32 = vld [vmem:[%s3978_s15 + $0xb0] sm:$0xff]   ;;  %v3046_v40 = vld [vmem:[%s3978_s15 + $0xb8] sm:$0xff]   ;;  %v567_v45 = vrot.slane %v4051_v39, 7  ;;  %v593_v46 = vrot.slane %v4051_v39, 1  ;;  %v626_v48 = vpack.c.bf16 %v4051_v39, %v3503_v47  ;;  %v3047_v49 = vld [vmem:[%s3978_s15 + $0x140] sm:$0xff]   ;;  %p4864_p6 = scmp.ne.s32.totalorder %s4861_s27, 0 }
 0x143   : > { %2660 = vmatpush3.bf16.msra.mxu1 %v3025_v15  ;;  %v4054_v41 = vld [vmem:[#allocation2 + $0x1c] sm:$0xf]  ;;  %v4074_v50 = vld [vmem:[#allocation2 + $0x8] sm:$0xf]  ;;  %v568_v51 = vrot.slane %v558_v42, 7  ;;  %vm4079_vm5 = vmpackc.low %vm583_vm0, %vm583_vm0  ;;  %v594_v56 = vrot.slane %v558_v42, 1 }
 0x144   : > { %2661 = vmatprep.subr.bf16.mxu1 %v3028_v18  ;;  %v4058_v43 = vunpack.c.l.bf16 %v4054_v41  ;;  %v4084_v54 = vld [vmem:[#allocation2 + $0xc] sm:$0xf]  ;;  %v559_v55 = vunpack.c.l.bf16 %v4074_v50  ;;  %vm4090_vm6 = vmpackc.low %vm601_vm2, %vm3502_vm3  ;;  %1284 = vmatprep.mubr.bf16.mxu0 %v626_v48  ;;  %v3048_v60 = vld [vmem:[%s3978_s15 + $0x100] sm:$0xff]   ;;  %v4118_v8 = vcombine.low %v4048_v38, %v4074_v50  ;;  %p3301_p8 = pnand %p3300_p4, %p4864_p6 }
 0x145   : > { %2622 = vmatpush3.bf16.msra.mxu0 %v3027_v17  ;;  %v560_v58 = vunpack.c.l.bf16 %v4084_v54  ;;  %v581_v59 = vsel %vm575_vm1, %v567_v45, %v568_v51  ;;  %v4106_v63 = vsel %vm601_vm2, %v593_v46, %v594_v56  ;;  %v3049_v0 = vld [vmem:[%s3978_s15 + $0x1c0] sm:$0xff]   ;;  %v3051_v7 = vld [vmem:[%s3978_s15 + $0x148] sm:$0xff]   ;;  %v3056_v18 = vld [vmem:[%s3978_s15 + $0x150] sm:$0xff]  }
 0x146   : > { %2623 = vmatprep.subr.bf16.mxu0 %v3030_v20  ;;  %v574_v53 = vrot.slane %v4058_v43, 7  ;;  %v569_v62 = vrot.slane %v559_v55, 7  ;;  %v2478_v4 = vpack.c.bf16 %v4106_v63, %v3503_v47  ;;  %v3050_v5 = vld [vmem:[%s3978_s15 + $0x180] sm:$0xff]   ;;  %v595_v9 = vrot.slane %v559_v55, 1  ;;  %v3052_v11 = vld [vmem:[%s3978_s15 + $0x108] sm:$0xff]   ;;  %v3057_v20 = vld [vmem:[%s3978_s15 + $0x110] sm:$0xff]   ;;  %p3302_p7 = pneg %p3301_p8 }
 0x147   : > { %2662 = vmatpush3.bf16.msra.mxu1 %v3029_v19  ;;  %v570_v2 = vrot.slane %v560_v58, 7  ;;  %v596_v12 = vrot.slane %v560_v58, 1  ;;  %v3053_v14 = vld [vmem:[%s3978_s15 + $0x1c8] sm:$0xff]   ;;  %vm4149_vm7 = vmpackc.low %vm601_vm2, %vm601_vm2  ;;  %v3066_v42 = vld [vmem:[%s3978_s15 + $0x120] sm:$0xff]   ;;  %v643_v39 = vpack.c.bf16 %v3503_v47, %v4058_v43 }
 0x148   : > { %2663 = vmatprep.subr.bf16.mxu1 %v3032_v22  ;;  %v582_v61 = vsel %vm575_vm1, %v574_v53, %v567_v45  ;;  %v580_v6 = vsel %vm575_vm1, %v568_v51, %v569_v62  ;;  %v3055_v15 = vld [vmem:[%s3978_s15 + $0x188] sm:$0xff]   ;;  %v4137_v17 = vsel %vm601_vm2, %v594_v56, %v595_v9  ;;  %v3067_v45 = vld [vmem:[%s3978_s15 + $0x1e0] sm:$0xff]   ;;  %vm2519_vm8 = vmpackc.low %vm3502_vm3, %vm583_vm0 }
 0x149   : > { %2624 = vmatpush3.bf16.msra.mxu0 %v3031_v21  ;;  %v2463_v1 = vpack.c.bf16 %v582_v61, %v3503_v47  ;;  %v2475_v3 = vpack.c.bf16 %v581_v59, %v582_v61  ;;  %v579_v10 = vsel %vm575_vm1, %v569_v62, %v570_v2  ;;  %v4133_v16 = vsel %vm601_vm2, %v595_v9, %v596_v12  ;;  %v3068_v56 = vld [vmem:[%s3978_s15 + $0x1a0] sm:$0xff]   ;;  %v3069_v57 = vld [vmem:[%s3978_s15 + $0x168] sm:$0xff]   ;;  %vm2531_vm9 = vmpackc.low %vm3502_vm3, %vm601_vm2 }
 0x14a   : > { %2625 = vmatprep.subr.bf16.mxu0 %v3034_v24  ;;  %v2481_v13 = vpack.c.bf16 %v579_v10, %v580_v6  ;;  %v4141_v19 = vpack.c.bf16 %v580_v6, %v581_v59  ;;  %v4155_v22 = vpack.c.bf16 %v4133_v16, %v4137_v17  ;;  %v3059_v24 = vld [vmem:[%s3978_s15 + $0x190] sm:$0xff]   ;;  %v3070_v61 = vld [vmem:[%s3978_s15 + $0x128] sm:$0xff]  }
 0x14b   : > { %2664 = vmatpush3.bf16.msra.mxu1 %v3033_v23  ;;  %2476 = vmatprep.mubr.msk.bf16.mxu1 %vm4079_vm5, %v2475_v3  ;;  %v3058_v23 = vld [vmem:[%s3978_s15 + $0x1d0] sm:$0xff]  }
 0x14c   : > { %2665 = vmatprep.subr.bf16.mxu1 %v3036_v26  ;;  %v3061_v26 = vld [vmem:[%s3978_s15 + $0x118] sm:$0xff]   ;;  %v3074_v6 = vld [vmem:[%s3978_s15 + $0x170] sm:$0xff]  }
 0x14d   : > { %2626 = vmatpush3.bf16.msra.mxu0 %v3035_v25  ;;  %v3060_v25 = vld [vmem:[%s3978_s15 + $0x158] sm:$0xff]  }
 0x14e   : > { %2627 = vmatprep.subr.bf16.mxu0 %v3038_v28  ;;  %v4168_v28 = vld [vmem:[#allocation2 + $0x10] sm:$0xf] }
 0x14f   : > { %2666 = vmatpush3.bf16.msra.mxu1 %v3037_v27  ;;  %v3062_v27 = vld [vmem:[%s3978_s15 + $0x1d8] sm:$0xff]  }
 0x150   : > { %2667 = vmatprep.subr.bf16.mxu1 %v3040_v31  ;;  %v4173_v31 = vcombine.low %v4084_v54, %v4168_v28 }
 0x151   : > { %2628 = vmatpush3.bf16.msra.mxu0 %v3039_v30  ;;  %v561_v30 = vunpack.c.l.bf16 %v4168_v28 }
 0x152   : > { %2629 = vmatprep.subr.bf16.mxu0 %v3042_v33  ;;  %v3065_v33 = vld [vmem:[%s3978_s15 + $0x160] sm:$0xff]  }
 0x153   : > { %2668 = vmatpush3.bf16.msra.mxu1 %v3041_v32  ;;  %v3064_v32 = vld [vmem:[%s3978_s15 + $0x198] sm:$0xff]   ;;  %v597_v44 = vrot.slane %v561_v30, 1 }
 0x154   : > { %2669 = vmatprep.subr.bf16.mxu1 %v3044_v36  ;;  %v571_v36 = vrot.slane %v561_v30, 7  ;;  %v3082_v30 = vld [vmem:[%s3978_s15 + $0x200] sm:$0xff]  }
 0x155   : > { %2630 = vmatpush3.bf16.msra.mxu0 %v3043_v35  ;;  %v4177_v35 = vld [vmem:[#allocation2 + $0x14] sm:$0xf]  ;;  %v4187_v55 = vsel %vm601_vm2, %v596_v12, %v597_v44 }
 0x156   : > { %2695 = vmatprep.subr.bf16.mxu0 %v3047_v49  ;;  %v578_v48 = vsel %vm575_vm1, %v570_v2, %v571_v36  ;;  %v4208_v2 = vld [vmem:[#allocation2 + $0x18] sm:$0xf]  ;;  %v3076_v12 = vld [vmem:[%s3978_s15 + $0x1f0] sm:$0xff]  }
 0x157   : > { %2670 = vmatpush3.bf16.msra.mxu1 %v3046_v40  ;;  %v562_v40 = vunpack.c.l.bf16 %v4177_v35  ;;  %v4191_v58 = vpack.c.bf16 %v578_v48, %v579_v10  ;;  %v563_v3 = vunpack.c.l.bf16 %v4208_v2  ;;  %v3075_v10 = vld [vmem:[%s3978_s15 + $0x130] sm:$0xff]  }
 0x158   : > { %2735 = vmatprep.subr.bf16.mxu1 %v3049_v0  ;;  %2464 = vmatmul.mubr.msk.bf16.vlgmr.msra.gmra.mrb[0].mxu0 %vm4065_vm4, %v2463_v1  ;;  %v3071_v1 = vld [vmem:[%s3978_s15 + $0x1e8] sm:$0xff]  }
 0x159   : > { %2696 = vmatpush3.bf16.msra.mxu0 %v3048_v60  ;;  %1292 = vmatprep.mubr.bf16.mxu0 %v4118_v8  ;;  %v572_v49 = vrot.slane %v562_v40, 7  ;;  %v598_v51 = vrot.slane %v562_v40, 1  ;;  %v573_v9 = vrot.slane %v563_v3, 7  ;;  %v3085_v40 = vld [vmem:[%s3978_s15 + $0x210] sm:$0xff]  }
 0x15a   : > { %2479 = vmatmul.mubr.msk.bf16.vlgmr.msra.gmra.mrb[0].mxu1 %vm4090_vm6, %v2478_v4  ;;  %2697 = vmatprep.subr.bf16.mxu0 %v3051_v7  ;;  %v4213_v4 = vcombine.low %v4177_v35, %v4208_v2  ;;  %v600_v7 = vrot.slane %v4058_v43, 1 }
 0x15b   : > { %2736 = vmatpush3.bf16.msra.mxu1 %v3050_v5  ;;  %2482 = vmatprep.mubr.msk.bf16.mxu1 %vm4079_vm5, %v2481_v13  ;;  %v577_v59 = vsel %vm575_vm1, %v571_v36, %v572_v49  ;;  %v4197_v60 = vsel %vm601_vm2, %v597_v44, %v598_v51  ;;  %v3073_v5 = vld [vmem:[%s3978_s15 + $0x1a8] sm:$0xff]   ;;  %v576_v13 = vsel %vm575_vm1, %v572_v49, %v573_v9 }
 0x15c   : > { %2737 = vmatprep.subr.bf16.mxu1 %v3053_v14  ;;  %v2487_v62 = vpack.c.bf16 %v577_v59, %v578_v48  ;;  %v4205_v0 = vpack.c.bf16 %v4197_v60, %v4187_v55  ;;  %v4232_v14 = vsel %vm575_vm1, %v573_v9, %v574_v53  ;;  %v3083_v36 = vld [vmem:[%s3978_s15 + $0x208] sm:$0xff]  }
 0x15d   : > { %2698 = vmatpush3.bf16.msra.mxu0 %v3052_v11  ;;  %v599_v11 = vrot.slane %v563_v3, 1  ;;  %v2520_v43 = vpack.c.bf16 %v3503_v47, %v4232_v14 }
 0x15e   : > { %2699 = vmatprep.subr.bf16.mxu0 %v3056_v18  ;;  %v2499_v18 = vpack.c.bf16 %v4137_v17, %v4106_v63  ;;  %v3080_v63 = vld [vmem:[%s3978_s15 + $0x1f8] sm:$0xff]  }
 0x15f   : > { %2738 = vmatpush3.bf16.msra.mxu1 %v3055_v15  ;;  %v3077_v15 = vld [vmem:[%s3978_s15 + $0x1b0] sm:$0xff]   ;;  %v3081_v17 = vld [vmem:[%s3978_s15 + $0x1b8] sm:$0xff]  }
 0x160   : > { %2739 = vmatprep.subr.bf16.mxu1 %v3058_v23  ;;  %2467 = vmatmul.mubr.msk.bf16.gmra.mrb[4].mxu0 %vm4079_vm5, %v4141_v19  ;;  %v2493_v23 = vpack.c.bf16 %v4232_v14, %v576_v13 }
 0x161   : > { %2700 = vmatpush3.bf16.msra.mxu0 %v3057_v20  ;;  %1300 = vmatprep.mubr.bf16.mxu0 %v4173_v31  ;;  %v2472_v20 = vpack.c.bf16 %v576_v13, %v577_v59 }
 0x162   : > { %2485 = vmatmul.mubr.msk.bf16.gmra.mrb[4].mxu1 %vm4149_vm7, %v4155_v22  ;;  %2701 = vmatprep.subr.bf16.mxu0 %v3060_v25  ;;  %v603_v25 = vsel %vm601_vm2, %v598_v51, %v599_v11  ;;  %v1871_v51 = vld [vmem:[#allocation14] sm:$0xff] }
 0x163   : > { %2740 = vmatpush3.bf16.msra.mxu1 %v3059_v24  ;;  %2488 = vmatprep.mubr.msk.bf16.mxu1 %vm4079_vm5, %v2487_v62  ;;  %v602_v24 = vsel %vm601_vm2, %v599_v11, %v600_v7 }
 0x164   : > { %2741 = vmatprep.subr.bf16.mxu1 %v3062_v27  ;;  %v4243_v53 = vpack.c.bf16 %v602_v24, %v603_v25  ;;  %v3079_v27 = vld [vmem:[%s3978_s15 + $0x138] sm:$0xff]  }
 0x165   : > { %2702 = vmatpush3.bf16.msra.mxu0 %v3061_v26  ;;  %v3078_v26 = vld [vmem:[%s3978_s15 + $0x178] sm:$0xff]  }
 0x166   : > { %2703 = vmatprep.subr.bf16.mxu0 %v3065_v33  ;;  %v2502_v33 = vpack.c.bf16 %v4187_v55, %v4133_v16  ;;  %v3088_v16 = vld [vmem:[%s3978_s15 + $0x220] sm:$0xff]  }
 0x167   : > { %2742 = vmatpush3.bf16.msra.mxu1 %v3064_v32  ;;  %v2385_v32 = vcombine.low %v4046_v37, %v4048_v38  ;;  %v2386_v37 = vcombine.low %v4074_v50, %v4084_v54  ;;  %v2505_v38 = vpack.c.bf16 %v603_v25, %v4197_v60  ;;  %v620_v50 = vsel %vm601_vm2, %v600_v7, %v593_v46  ;;  %v3091_v46 = vld [vmem:[%s3978_s15 + $0x230] sm:$0xff]  }
 0x168   : > { %2743 = vmatprep.subr.bf16.mxu1 %v3067_v45  ;;  %2470 = vmatmul.mubr.msk.bf16.gmra.mrb[8].mxu0 %vm4079_vm5, %v4191_v58  ;;  %v2387_v54 = vcombine.low %v4168_v28, %v4177_v35  ;;  %v2388_v28 = vcombine.low %v4208_v2, %v4054_v41  ;;  %v3092_v35 = vld [vmem:[%s3978_s15 + $0x238] sm:$0xff]   ;;  %v2532_v41 = vpack.c.bf16 %v3503_v47, %v620_v50 }
 0x169   : > { %2704 = vmatpush3.bf16.msra.mxu0 %v3066_v42  ;;  %1308 = vmatprep.mubr.bf16.mxu0 %v4213_v4 }
 0x16a   : > { %2705 = vmatprep.subr.bf16.mxu0 %v3069_v57  ;;  %2491 = vmatmul.mubr.msk.bf16.gmra.mrb[8].mxu1 %vm4149_vm7, %v4205_v0 }
 0x16b   : > { %2744 = vmatpush3.bf16.msra.mxu1 %v3068_v56  ;;  %2494 = vmatprep.mubr.msk.bf16.mxu1 %vm4079_vm5, %v2493_v23 }
 0x16c   : > { %2745 = vmatprep.subr.bf16.mxu1 %v3071_v1 }
 0x16d   : > { %2706 = vmatpush3.bf16.msra.mxu0 %v3070_v61 }
 0x16e   : > { %2707 = vmatprep.subr.bf16.mxu0 %v3074_v6 }
 0x16f   : > { %2746 = vmatpush3.bf16.msra.mxu1 %v3073_v5 }
 0x170   : > { %2747 = vmatprep.subr.bf16.mxu1 %v3076_v12  ;;  %2473 = vmatmul.mubr.msk.bf16.gmra.mrb[12].mxu0 %vm4079_vm5, %v2472_v20 }
 0x171   : > { %2708 = vmatpush3.bf16.msra.mxu0 %v3075_v10  ;;  %2500 = vmatprep.mubr.msk.bf16.mxu0 %vm4149_vm7, %v2499_v18 }
 0x172   : > { %2709 = vmatprep.subr.bf16.mxu0 %v3078_v26  ;;  %2497 = vmatmul.mubr.msk.bf16.gmra.mrb[12].mxu1 %vm4149_vm7, %v4243_v53 }
 0x173   : > { %2748 = vmatpush3.bf16.msra.mxu1 %v3077_v15  ;;  %1479 = vmatprep.mubr.bf16.mxu1 %v4118_v8  ;;  %v3086_v8 = vld [vmem:[%s3978_s15 + $0x218] sm:$0xff]  }
 0x174   : > { %2749 = vmatprep.subr.bf16.mxu1 %v3080_v63 }
 0x175   : > { %2710 = vmatpush3.bf16.msra.mxu0 %v3079_v27 }
 0x176   : > { %2792 = vmatprep.subr.bf16.mxu0 %v3082_v30 }
 0x177   : > { %2750 = vmatpush3.bf16.msra.mxu1 %v3081_v17 }
 0x178   : > { %2816 = vmatprep.subr.mxu1 %v3503_v47  ;;  %1415 = vmatmul.mubr.bf16.vlgmr.msra.gmra.mrb[16].mxu0 %v2385_v32 }
 0x179   : > { %2793 = vmatpush3.bf16.msra.mxu0 %v3082_v30  ;;  %2503 = vmatprep.mubr.msk.bf16.mxu0 %vm4149_vm7, %v2502_v33 }
 0x17a   : > { %2794 = vmatprep.subr.bf16.mxu0 %v3083_v36  ;;  %2512 = vmatmul.mubr.msk.bf16.vlgmr.msra.gmra.mrb[16].mxu1 %vm4079_vm5, %v4141_v19  ;;  %v2508_v19 = vpack.c.bf16 %v620_v50, %v602_v24 }
 0x17b   : > { %1487 = vmatprep.mubr.bf16.mxu1 %v4173_v31  ;;  %v3089_v31 = vld [vmem:[%s3978_s15 + $0x228] sm:$0xff]   ;;  %2817 = vmatpush3.msra.mxu1 %v1871_v51  ;;  %s2567_s15 = sshll.u32 %s4614_s14, 9 }
 0x17d   : > { %2795 = vmatpush3.bf16.msra.mxu0 %v3083_v36 }
 0x17e   : > { %2796 = vmatprep.subr.bf16.mxu0 %v3085_v40 }
 0x180   : > { %1423 = vmatmul.mubr.bf16.gmra.mrb[20].mxu0 %v2386_v37 }
 0x181   : > { %2797 = vmatpush3.bf16.msra.mxu0 %v3085_v40  ;;  %2506 = vmatprep.mubr.msk.bf16.mxu0 %vm4149_vm7, %v2505_v38 }
 0x182   : > { %2798 = vmatprep.subr.bf16.mxu0 %v3086_v8  ;;  %2515 = vmatmul.mubr.msk.bf16.gmra.mrb[20].mxu1 %vm4079_vm5, %v4191_v58 }
 0x183   : > { %1495 = vmatprep.mubr.bf16.mxu1 %v4213_v4 }
 0x185   : > { %2799 = vmatpush3.bf16.msra.mxu0 %v3086_v8 }
 0x186   : > { %2800 = vmatprep.subr.bf16.mxu0 %v3088_v16 }
 0x188   : > { %1431 = vmatmul.mubr.bf16.gmra.mrb[24].mxu0 %v2387_v54 }
 0x189   : > { %2801 = vmatpush3.bf16.msra.mxu0 %v3088_v16  ;;  %2509 = vmatprep.mubr.msk.bf16.mxu0 %vm4149_vm7, %v2508_v19 }
 0x18a   : > { %2802 = vmatprep.subr.bf16.mxu0 %v3089_v31  ;;  %2518 = vmatmul.mubr.msk.bf16.gmra.mrb[24].mxu1 %vm4079_vm5, %v2472_v20 }
 0x18b   : > { %1503 = vmatprep.mubr.bf16.mxu1 %v643_v39 }
 0x18d   : > { %2803 = vmatpush3.bf16.msra.mxu0 %v3089_v31 }
 0x18e   : > { %2804 = vmatprep.subr.bf16.mxu0 %v3091_v46 }
 0x190   : > { %1439 = vmatmul.mubr.bf16.gmra.mrb[28].mxu0 %v2388_v28 }
 0x191   : > { %2805 = vmatpush3.bf16.msra.mxu0 %v3091_v46  ;;  %2808 = vmatprep.mubr.msk.bf16.mxu0 %vm4149_vm7, %v4155_v22  ;;  %v2389_v22 = vld [vmem:[%s443_s11] ss:$0 sm:$0xff]  ;;  %s4862_s11 = sld [smem:[#allocation44_spill]] }
 0x192   : > { %2806 = vmatprep.subr.bf16.mxu0 %v3092_v35  ;;  %2521 = vmatmul.mubr.msk.bf16.gmra.mrb[28].mxu1 %vm2519_vm8, %v2520_v43 }
 0x193   : > { %2818 = vmatprep.mubr.msk.f32.mxu1 %vm3504_vm10, %v3503_v47 }
 0x195   : > { %2807 = vmatpush3.bf16.msra.mxu0 %v3092_v35 }
 0x197   : > { %s4863_s7 = smov %s4862_s11 }
 0x198   : > { %2809 = vmatmul.mubr.msk.bf16.vlgmr.msra.gmra.mrb[32].mxu0 %vm4149_vm7, %v4205_v0 }
 0x199   : > { %2812 = vmatprep.mubr.msk.bf16.mxu0 %vm4149_vm7, %v4243_v53 }
 0x1a0   : > { %2813 = vmatmul.mubr.msk.bf16.gmra.mrb[36].mxu0 %vm2531_vm9, %v2532_v41 }
 0x22b   : > { %v2631_v52 = vpop.f32.mrb[0].mxu0 }
 0x22c   : > { %v2632_v42 = vpop.f32.mrb[1].mxu0 }
 0x22d   : > { %v2671_v44 = vpop.f32.mrb[0].mxu1  ;;  %v2633_v45 = vadd.f32 %v2632_v42, %v2631_v52  ;;  %v2634_v48 = vpop.f32.mrb[2].mxu0 }
 0x22e   : > { %v2672_v49 = vpop.f32.mrb[1].mxu1  ;;  %v2635_v55 = vpop.f32.mrb[3].mxu0 }
 0x22f   : > { %v2673_v56 = vadd.f32 %v2672_v49, %v2671_v44  ;;  %v2674_v21 = vpop.f32.mrb[2].mxu1  ;;  %v1287_v57 = vadd.f32 %v2633_v45, %v2389_v22  ;;  %v2636_v58 = vadd.f32 %v2635_v55, %v2634_v48 }
 0x230   : > { %v2675_v59 = vpop.f32.mrb[3].mxu1 }
 0x231   : > { %v2676_v60 = vadd.f32 %v2675_v59, %v2674_v21  ;;  %v1290_v61 = vadd.f32 %v2636_v58, %v2389_v22  ;;  %v1352_v62 = vadd.f32 %v2673_v56, %v1287_v57 }
 0x233   : > { %v1355_v0 = vadd.f32 %v2676_v60, %v1290_v61  ;;  %v2637_v1 = vpop.f32.mrb[4].mxu0 }
 0x234   : > { %v2638_v2 = vpop.f32.mrb[5].mxu0 }
 0x235   : > { %v2677_v3 = vpop.f32.mrb[4].mxu1  ;;  %v2639_v4 = vadd.f32 %v2638_v2, %v2637_v1  ;;  %v2640_v5 = vpop.f32.mrb[6].mxu0 }
 0x236   : > { %v2678_v6 = vpop.f32.mrb[5].mxu1  ;;  %v2641_v7 = vpop.f32.mrb[7].mxu0 }
 0x237   : > { %v2679_v9 = vadd.f32 %v2678_v6, %v2677_v3  ;;  %v2680_v10 = vpop.f32.mrb[6].mxu1  ;;  %v1295_v11 = vadd.f32 %v2639_v4, %v2389_v22  ;;  %v2642_v12 = vadd.f32 %v2641_v7, %v2640_v5 }
 0x238   : > { %v2681_v13 = vpop.f32.mrb[7].mxu1 }
 0x239   : > { %v2682_v14 = vadd.f32 %v2681_v13, %v2680_v10  ;;  %v1298_v15 = vadd.f32 %v2642_v12, %v2389_v22  ;;  %v1360_v18 = vadd.f32 %v2679_v9, %v1295_v11 }
 0x23b   : > { %v1363_v20 = vadd.f32 %v2682_v14, %v1298_v15  ;;  %v2643_v23 = vpop.f32.mrb[8].mxu0 }
 0x23c   : > { %v2644_v24 = vpop.f32.mrb[9].mxu0 }
 0x23d   : > { %v2645_v25 = vadd.f32 %v2644_v24, %v2643_v23  ;;  %v2646_v26 = vpop.f32.mrb[10].mxu0  ;;  %v2683_v53 = vpop.f32.mrb[8].mxu1 }
 0x23e   : > { %v2647_v27 = vpop.f32.mrb[11].mxu0  ;;  %v2684_v30 = vpop.f32.mrb[9].mxu1 }
 0x23f   : > { %v1303_v63 = vadd.f32 %v2645_v25, %v2389_v22  ;;  %v2648_v17 = vadd.f32 %v2647_v27, %v2646_v26  ;;  %v2685_v32 = vadd.f32 %v2684_v30, %v2683_v53  ;;  %v2686_v33 = vpop.f32.mrb[10].mxu1 }
 0x240   : > { %v2687_v40 = vpop.f32.mrb[11].mxu1 }
 0x241   : > { %v1306_v36 = vadd.f32 %v2648_v17, %v2389_v22  ;;  %v1368_v37 = vadd.f32 %v2685_v32, %v1303_v63  ;;  %v2688_v38 = vadd.f32 %v2687_v40, %v2686_v33 }
 0x243   : > { %v2649_v8 = vpop.f32.mrb[12].mxu0  ;;  %v1371_v16 = vadd.f32 %v2688_v38, %v1306_v36 }
 0x244   : > { %v2650_v50 = vpop.f32.mrb[13].mxu0 }
 0x245   : > { %v2651_v54 = vadd.f32 %v2650_v50, %v2649_v8  ;;  %v2652_v19 = vpop.f32.mrb[14].mxu0  ;;  %v2689_v31 = vpop.f32.mrb[12].mxu1 }
 0x246   : > { %v2653_v39 = vpop.f32.mrb[15].mxu0  ;;  %v2690_v35 = vpop.f32.mrb[13].mxu1 }
 0x247   : > { %v1311_v46 = vadd.f32 %v2651_v54, %v2389_v22  ;;  %v2654_v28 = vadd.f32 %v2653_v39, %v2652_v19  ;;  %v2691_v43 = vadd.f32 %v2690_v35, %v2689_v31  ;;  %v2692_v41 = vpop.f32.mrb[14].mxu1 }
 0x248   : > { %v2693_v42 = vpop.f32.mrb[15].mxu1 }
 0x249   : > { %v1314_v52 = vadd.f32 %v2654_v28, %v2389_v22  ;;  %v1376_v44 = vadd.f32 %v2691_v43, %v1311_v46  ;;  %v2694_v45 = vadd.f32 %v2693_v42, %v2692_v41  ;;  %v1697_v43 = vsub.s32 1, %v4041_v34 }
 0x24a   : > { %v1685_v42 = vsub.s32 0, %v4041_v34 }
 0x24b   : > { %v2711_v48 = vpop.f32.mrb[16].mxu0  ;;  %v1379_v49 = vadd.f32 %v2694_v45, %v1314_v52  ;;  %v1633_v52 = vld [vmem:[%s3986_s12] sm:$0xff] }
 0x24c   : > { %v2712_v51 = vpop.f32.mrb[17].mxu0 }
 0x24d   : > { %v2713_v55 = vadd.f32 %v2712_v51, %v2711_v48  ;;  %v2714_v56 = vpop.f32.mrb[18].mxu0  ;;  %v2751_v21 = vpop.f32.mrb[16].mxu1 }
 0x24e   : > { %v2715_v57 = vpop.f32.mrb[19].mxu0  ;;  %v2752_v60 = vpop.f32.mrb[17].mxu1 }
 0x24f   : > { %v1417_v58 = vadd.f32 %v2713_v55, %v1352_v62  ;;  %v2716_v59 = vadd.f32 %v2715_v57, %v2714_v56  ;;  %v2753_v61 = vadd.f32 %v2752_v60, %v2751_v21  ;;  %v2754_v1 = vpop.f32.mrb[18].mxu1  ;;  %v4331_v57 = vrot.slane %v1633_v52, %v1697_v43 }
 0x250   : > { %v2755_v3 = vpop.f32.mrb[19].mxu1  ;;  %v4333_v60 = vrot.slane %v1633_v52, %v1685_v42 }
 0x251   : > { %v1420_v2 = vadd.f32 %v2716_v59, %v1355_v0  ;;  %v2756_v4 = vadd.f32 %v2755_v3, %v2754_v1  ;;  %v4320_v5 = vadd.f32 %v2753_v61, %v1417_v58  ;;  %v1717_v61 = vsub.s32 2, %v4041_v34 }
 0x252   : > { %v1757_v3 = vsub.s32 4, %v4041_v34 }
 0x253   : > { %v2717_v22 = vpop.f32.mrb[20].mxu0  ;;  %v4322_v7 = vadd.f32 %v2756_v4, %v1420_v2  ;;  %v1737_v2 = vsub.s32 3, %v4041_v34 }
 0x254   : > { %v2718_v6 = vpop.f32.mrb[21].mxu0 }
 0x255   : > { %v2719_v9 = vadd.f32 %v2718_v6, %v2717_v22  ;;  %v2720_v10 = vpop.f32.mrb[22].mxu0  ;;  %v2757_v11 = vpop.f32.mrb[20].mxu1 }
 0x256   : > { %v2721_v12 = vpop.f32.mrb[23].mxu0  ;;  %v2758_v62 = vpop.f32.mrb[21].mxu1 }
 0x257   : > { %v1425_v13 = vadd.f32 %v2719_v9, %v1360_v18  ;;  %v2722_v14 = vadd.f32 %v2721_v12, %v2720_v10  ;;  %v2759_v15 = vadd.f32 %v2758_v62, %v2757_v11  ;;  %v2760_v23 = vpop.f32.mrb[22].mxu1  ;;  %v1699_v9 = vmul.f32 0.0, %v4331_v57 }
 0x258   : > { %v2761_v25 = vpop.f32.mrb[23].mxu1  ;;  %v1777_v12 = vsub.s32 5, %v4041_v34 }
 0x259   : > { %v1428_v24 = vadd.f32 %v2722_v14, %v1363_v20  ;;  %v2762_v0 = vadd.f32 %v2761_v25, %v2760_v23  ;;  %v1490_v26 = vadd.f32 %v2759_v15, %v1425_v13  ;;  %v1797_v13 = vsub.s32 6, %v4041_v34 }
 0x25a   : > { %v4346_v23 = vrot.slane %v1633_v52, %v1717_v61 }
 0x25b   : > { %v2723_v53 = vpop.f32.mrb[24].mxu0  ;;  %v1493_v63 = vadd.f32 %v2762_v0, %v1428_v24  ;;  %v4351_v0 = vrot.slane %v1633_v52, %v1757_v3 }
 0x25c   : > { %v2724_v27 = vpop.f32.mrb[25].mxu0 }
 0x25d   : > { %v2725_v17 = vadd.f32 %v2724_v27, %v2723_v53  ;;  %v2726_v30 = vpop.f32.mrb[26].mxu0  ;;  %v2763_v32 = vpop.f32.mrb[24].mxu1  ;;  %v4357_v53 = vrot.slane %v1633_v52, %v1737_v2 }
 0x25e   : > { %v2727_v33 = vpop.f32.mrb[27].mxu0  ;;  %v2764_v38 = vpop.f32.mrb[25].mxu1 }
 0x25f   : > { %v1433_v36 = vadd.f32 %v2725_v17, %v1368_v37  ;;  %v2728_v40 = vadd.f32 %v2727_v33, %v2726_v30  ;;  %v2765_v18 = vadd.f32 %v2764_v38, %v2763_v32  ;;  %v2766_v8 = vpop.f32.mrb[26].mxu1  ;;  %v1719_v17 = vmul.f32 0.0, %v4346_v23 }
 0x260   : > { %v2767_v54 = vpop.f32.mrb[27].mxu1  ;;  %v4363_v32 = vrot.slane %v1633_v52, %v1777_v12  ;;  %v4365_v33 = vrot.slane %v1633_v52, %v1797_v13 }
 0x261   : > { %v1436_v50 = vadd.f32 %v2728_v40, %v1371_v16  ;;  %v2768_v19 = vadd.f32 %v2767_v54, %v2766_v8  ;;  %v4324_v20 = vadd.f32 %v2765_v18, %v1433_v36 }
 0x263   : > { %v2729_v31 = vpop.f32.mrb[28].mxu0  ;;  %v4326_v46 = vadd.f32 %v2768_v19, %v1436_v50 }
 0x264   : > { %v2730_v39 = vpop.f32.mrb[29].mxu0 }
 0x265   : > { %v2731_v28 = vadd.f32 %v2730_v39, %v2729_v31  ;;  %v2732_v35 = vpop.f32.mrb[30].mxu0  ;;  %v2769_v41 = vpop.f32.mrb[28].mxu1 }
 0x266   : > { %v2733_v37 = vpop.f32.mrb[31].mxu0  ;;  %v2770_v16 = vpop.f32.mrb[29].mxu1 }
 0x267   : > { %v1441_v45 = vadd.f32 %v2731_v28, %v1376_v44  ;;  %v2734_v48 = vadd.f32 %v2733_v37, %v2732_v35  ;;  %v2771_v51 = vadd.f32 %v2770_v16, %v2769_v41  ;;  %v2772_v55 = vpop.f32.mrb[30].mxu1  ;;  %v1817_v44 = vsub.s32 7, %v4041_v34 }
 0x268   : > { %v2773_v21 = vpop.f32.mrb[31].mxu1 }
 0x269   : > { %v1444_v56 = vadd.f32 %v2734_v48, %v1379_v49  ;;  %v2774_v58 = vadd.f32 %v2773_v21, %v2772_v55  ;;  %v1506_v59 = vadd.f32 %v2771_v51, %v1441_v45  ;;  %v1687_v49 = vmul.f32 0.0, %v4333_v60 }
 0x26b   : > { %v2810_v1 = vpop.f32.mrb[32].mxu0  ;;  %v1509_v6 = vadd.f32 %v2774_v58, %v1444_v56  ;;  %v1707_v27 = vadd.f32 %v1699_v9, %v1687_v49 }
 0x26c   : > { %v1555_v4 = vadd.f32 %v2810_v1, %v1490_v26  ;;  %v1546_v22 = vpop.f32.mrb[33].mxu0  ;;  %v4353_v26 = vrot.slane %v1633_v52, %v1817_v44 }
 0x26d   : > { %v1547_v10 = vadd.f32 %v1546_v22, %v4320_v5  ;;  %v2811_v11 = vpop.f32.mrb[34].mxu0  ;;  %v1727_v43 = vadd.f32 %v1719_v17, %v1707_v27 }
 0x26e   : > { %v4344_v14 = vmax.f32 %v1555_v4, 0.0  ;;  %v1558_v62 = vadd.f32 %v2811_v11, %v1493_v63  ;;  %v1549_v15 = vpop.f32.mrb[35].mxu0 }
 0x26f   : > { %v4348_v24 = vmax.f32 %v1547_v10, 0.0  ;;  %v1550_v25 = vadd.f32 %v1549_v15, %v4322_v7 }
 0x270   : > { %v4355_v5 = vmax.f32 %v1558_v62, 0.0  ;;  %v1637_v30 = vrot.slane %v4344_v14, 7  ;;  %v1659_v40 = vrot.slane %v4344_v14, 1  ;;  %v1761_v45 = vmul.f32 %v4351_v0, %v4344_v14 }
 0x271   : > { %v4360_v63 = vmax.f32 %v1550_v25, 0.0  ;;  %v1635_v18 = vrot.slane %v4348_v24, 7  ;;  %v1657_v48 = vrot.slane %v4348_v24, 1  ;;  %v1700_v16 = vmul.f32 %v4331_v57, %v4348_v24 }
 0x272   : > { %v2577_v7 = vpack.c.bf16 %v4355_v5, %v4344_v14  ;;  %v1638_v36 = vrot.slane %v4355_v5, 7  ;;  %v1660_v38 = vrot.slane %v4355_v5, 1  ;;  %v1703_v62 = vmul.f32 %v4331_v57, %v4355_v5 }
 0x273   : > { %v2572_v8 = vpack.c.bf16 %v4360_v63, %v4348_v24  ;;  %v1636_v50 = vrot.slane %v4360_v63, 7  ;;  %v1658_v54 = vrot.slane %v4360_v63, 1  ;;  %v2814_v19 = vpop.f32.mrb[36].mxu0 }
 0x274   : > { %2609 = vst [vmem:[#allocation2 + $0x8] sm:$0xff] %v2577_v7   ;;  %2612 = vst [vmem:[%s4002_s10 + $0x8] sm:$0xff] %v2577_v7   ;;  %v1571_v31 = vadd.f32 %v2814_v19, %v1506_v59  ;;  %v1562_v39 = vpop.f32.mrb[37].mxu0  ;;  %v1646_v28 = vsel %vm575_vm1, %v1637_v30, %v1638_v36  ;;  %v1669_v35 = vsel %vm601_vm2, %v1659_v40, %v1660_v38 }
 0x275   : > { %2573 = vst [vmem:[#allocation2] sm:$0xff] %v2572_v8   ;;  %2593 = vst [vmem:[%s4002_s10] sm:$0xff] %v2572_v8   ;;  %v1563_v41 = vadd.f32 %v1562_v39, %v4324_v20  ;;  %v2815_v37 = vpop.f32.mrb[38].mxu0  ;;  %v1647_v52 = vsel %vm575_vm1, %v1636_v50, %v1637_v30  ;;  %v1648_v42 = vsel %vm575_vm1, %v1635_v18, %v1636_v50  ;;  %v1653_v4 = vsel %vm583_vm0, %v1646_v28, 0.0 }
 0x276   : > { %v1574_v51 = vadd.f32 %v2815_v37, %v1509_v6  ;;  %v1565_v55 = vpop.f32.mrb[39].mxu0  ;;  %v4397_v20 = vsel %vm583_vm0, %v1648_v42, 0.0  ;;  %v1670_v58 = vsel %vm601_vm2, %v1658_v54, %v1659_v40  ;;  %v1701_v59 = vmul.f32 %v4331_v57, %v4360_v63 }
 0x277   : > { %v4399_v56 = vmax.f32 %v1563_v41, 0.0  ;;  %v1566_v21 = vadd.f32 %v1565_v55, %v4326_v46  ;;  %v4406_v61 = vmax.f32 %v1571_v31, 0.0  ;;  %v4412_v2 = vsel %vm601_vm2, %v1670_v58, 0.0 }
 0x278   : > { %v4408_v1 = vmax.f32 %v1574_v51, 0.0  ;;  %v1689_v3 = vmul.f32 %v4333_v60, %v4397_v20  ;;  %v4420_v46 = vsel %vm583_vm0, %v1647_v52, 0.0  ;;  %v1721_v10 = vmul.f32 %v4346_v23, %v4412_v2  ;;  %v4474_v51 = vld [vmem:[%s3986_s12 + $0x8] ss:$0 sm:$0xff]  ;;  %s4623_s12 = scalar_lea.hbm %s4862_s11, %s2567_s15 }
 0x279   : > { %v4416_v44 = vmax.f32 %v1566_v21, 0.0  ;;  %v1661_v22 = vrot.slane %v4399_v56, 1  ;;  %v4436_v13 = vsel %vm601_vm2, %v1669_v35, 0.0  ;;  %v1741_v27 = vmul.f32 %v4357_v53, %v4420_v46 }
 0x27a   : > { %v2587_v6 = vpack.c.bf16 %v4408_v1, %v4406_v61  ;;  %v1642_v49 = vrot.slane %v4408_v1, 7  ;;  %v1709_v9 = vadd.f32 %v1701_v59, %v1689_v3  ;;  %v1691_v17 = vmul.f32 %v4333_v60, %v1653_v4 }
 0x27b   : > { %v2582_v11 = vpack.c.bf16 %v4416_v44, %v4399_v56  ;;  %v1668_v12 = vsel %vm601_vm2, %v1660_v38, %v1661_v22  ;;  %v1690_v30 = vmul.f32 %v4333_v60, %v4420_v46  ;;  %v1821_v40 = vmul.f32 %v4353_v26, %v4355_v5 }
 0x27c   : > { %2611 = vst [vmem:[#allocation2 + $0x18] sm:$0xff] %v2587_v6   ;;  %2614 = vst [vmem:[%s4002_s10 + $0x18] sm:$0xff] %v2587_v6   ;;  %v1675_v15 = vsel %vm601_vm2, %v1668_v12, 0.0  ;;  %v1729_v25 = vadd.f32 %v1721_v10, %v1709_v9  ;;  %v1649_v38 = vsel %vm575_vm1, %v1642_v49, %v1635_v18  ;;  %v1711_v50 = vadd.f32 %v1703_v62, %v1691_v17 }
 0x27d   : > { %2610 = vst [vmem:[#allocation2 + $0x10] sm:$0xff] %v2582_v11   ;;  %2613 = vst [vmem:[%s4002_s10 + $0x10] sm:$0xff] %v2582_v11   ;;  %v1723_v7 = vmul.f32 %v4346_v23, %v1675_v15  ;;  %v1650_v19 = vsel %vm583_vm0, %v1649_v38, 0.0  ;;  %v1671_v31 = vsel %vm601_vm2, %v1657_v48, %v1658_v54  ;;  %v1722_v39 = vmul.f32 %v4346_v23, %v4436_v13  ;;  %s3305_s10 = scalar_lea.vmem %s3304_s20, 1024 }
 0x27e   : > { %v1749_v8 = vadd.f32 %v1741_v27, %v1729_v25  ;;  %v1672_v28 = vsel %vm601_vm2, %v1671_v31, 0.0  ;;  %v1688_v35 = vmul.f32 %v4333_v60, %v1650_v19  ;;  %v1739_v18 = vmul.f32 %v4357_v53, %v1650_v19  ;;  %p3307_p12 = scmp.lt.s32.totalorder %s3305_s10, %s3299_s21 }
 0x27f   : > { %v1781_v37 = vmul.f32 %v4363_v32, %v4436_v13  ;;  %v1801_v52 = vmul.f32 %v4365_v33, %v1653_v4  ;;  %v4471_v42 = vadd.f32 %v1723_v7, %v1711_v50  ;;  %v1720_v55 = vmul.f32 %v4346_v23, %v1672_v28 }
 0x280   : > { %v1769_v41 = vadd.f32 %v1761_v45, %v1749_v8  ;;  %v1708_v54 = vadd.f32 %v1700_v16, %v1688_v35  ;;  %v1747_v21 = vadd.f32 %v1739_v18, %v1727_v43  ;;  %v1759_v58 = vmul.f32 %v4351_v0, %v4348_v24  ;;  %p3308_p0 = por %p3307_p12, %p3306_p9 }
 0x281   : > { %v1841_v3 = vmul.f32 %v4474_v51, %v1675_v15  ;;  %v1639_v45 = vrot.slane %v4399_v56, 7  ;;  %v1662_v6 = vrot.slane %v4416_v44, 1  ;;  %v1779_v11 = vmul.f32 %v4363_v32, %v1672_v28 }
 0x282   : > { %v1789_v59 = vadd.f32 %v1781_v37, %v1769_v41  ;;  %v1728_v9 = vadd.f32 %v1720_v55, %v1708_v54  ;;  %v1767_v10 = vadd.f32 %v1759_v58, %v1747_v21  ;;  %v1702_v16 = vmul.f32 %v4331_v57, %v4344_v14  ;;  %p3309_p2 = pnand %p3308_p0, %p3302_p7 }
 0x283   : > { %v1799_v43 = vmul.f32 %v4365_v33, %v4397_v20  ;;  %v1645_v62 = vsel %vm575_vm1, %v1638_v36, %v1639_v45  ;;  %v1667_v25 = vsel %vm601_vm2, %v1661_v22, %v1662_v6  ;;  %v1704_v19 = vmul.f32 %v4331_v57, %v4399_v56 }
 0x284   : > { %v1809_v12 = vadd.f32 %v1801_v52, %v1789_v59  ;;  %v1787_v27 = vadd.f32 %v1779_v11, %v1767_v10  ;;  %v1654_v17 = vsel %vm583_vm0, %v1645_v62, 0.0  ;;  %v4497_v7 = vsel %vm601_vm2, %v1667_v25, 0.0 }
 0x285   : > { %v1710_v38 = vadd.f32 %v1702_v16, %v1690_v30  ;;  %v1692_v50 = vmul.f32 %v4333_v60, %v1654_v17  ;;  %v1724_v36 = vmul.f32 %v4346_v23, %v4497_v7  ;;  %v1742_v22 = vmul.f32 %v4357_v53, %v1653_v4 }
 0x286   : > { %v1829_v8 = vadd.f32 %v1821_v40, %v1809_v12  ;;  %v1807_v31 = vadd.f32 %v1799_v43, %v1787_v27  ;;  %v1819_v28 = vmul.f32 %v4353_v26, %v4360_v63  ;;  %v1782_v18 = vmul.f32 %v4363_v32, %v1675_v15 }
 0x287   : > { %v1730_v35 = vadd.f32 %v1722_v39, %v1710_v38  ;;  %v1839_v30 = vmul.f32 %v4474_v51, %v4412_v2  ;;  %v1712_v40 = vadd.f32 %v1704_v19, %v1692_v50  ;;  %v1762_v54 = vmul.f32 %v4351_v0, %v4355_v5 }
 0x288   : > { %v1849_v41 = vadd.f32 %v1841_v3, %v1829_v8  ;;  %v1827_v37 = vadd.f32 %v1819_v28, %v1807_v31  ;;  %v1740_v4 = vmul.f32 %v4357_v53, %v4397_v20  ;;  %v1802_v21 = vmul.f32 %v4365_v33, %v1654_v17 }
 0x289   : > { %v1750_v52 = vadd.f32 %v1742_v22, %v1730_v35  ;;  %v1732_v55 = vadd.f32 %v1724_v36, %v1712_v40  ;;  %v1822_v15 = vmul.f32 %v4353_v26, %v4399_v56  ;;  %v1842_v39 = vmul.f32 %v4474_v51, %v4497_v7 }
 0x28a   : > { %1859 = vadd.xlane.f32.xlu1 %v1849_v41  ;;  %v1847_v58 = vadd.f32 %v1839_v30, %v1827_v37  ;;  %v1748_v3 = vadd.f32 %v1740_v4, %v1728_v9  ;;  %v1760_v10 = vmul.f32 %v4351_v0, %v4360_v63  ;;  %v1640_v5 = vrot.slane %v4416_v44, 7 }
 0x28b   : > { %v1770_v59 = vadd.f32 %v1762_v54, %v1750_v52  ;;  %v1641_v20 = vrot.slane %v4406_v61, 7  ;;  %v1663_v11 = vrot.slane %v4406_v61, 1  ;;  %v1664_v16 = vrot.slane %v4408_v1, 1 }
 0x28c   : > { %1855 = vadd.xlane.f32.xlu0 %v1847_v58  ;;  %v1768_v43 = vadd.f32 %v1760_v10, %v1748_v3  ;;  %v1780_v62 = vmul.f32 %v4363_v32, %v4412_v2  ;;  %v1800_v9 = vmul.f32 %v4365_v33, %v4420_v46  ;;  %v1644_v25 = vsel %vm575_vm1, %v1639_v45, %v1640_v5 }
 0x28d   : > { %v1790_v12 = vadd.f32 %v1782_v18, %v1770_v59  ;;  %v1643_v63 = vsel %vm575_vm1, %v1640_v5, %v1641_v20  ;;  %v1665_v27 = vsel %vm601_vm2, %v1663_v11, %v1664_v16  ;;  %v1666_v38 = vsel %vm601_vm2, %v1662_v6, %v1663_v11 }
 0x28e   : > { %v1788_v50 = vadd.f32 %v1780_v62, %v1768_v43  ;;  %v1655_v2 = vsel %vm583_vm0, %v1644_v25, 0.0  ;;  %v1656_v46 = vsel %vm583_vm0, %v1643_v63, 0.0  ;;  %v4543_v19 = vsel %vm601_vm2, %v1665_v27, 0.0 }
 0x28f   : > { %v1810_v8 = vadd.f32 %v1802_v21, %v1790_v12  ;;  %v1694_v45 = vmul.f32 %v4333_v60, %v1656_v46  ;;  %v1706_v36 = vmul.f32 %v4331_v57, %v4406_v61  ;;  %v1744_v22 = vmul.f32 %v4357_v53, %v1655_v2 }
 0x290   : > { %v1808_v31 = vadd.f32 %v1800_v9, %v1788_v50  ;;  %v1820_v28 = vmul.f32 %v4353_v26, %v4344_v14  ;;  %v1677_v35 = vsel %vm601_vm2, %v1666_v38, 0.0  ;;  %v1726_v41 = vmul.f32 %v4346_v23, %v4543_v19 }
 0x291   : > { %v1830_v6 = vadd.f32 %v1822_v15, %v1810_v8  ;;  %v1714_v18 = vadd.f32 %v1706_v36, %v1694_v45  ;;  %v1752_v30 = vadd.f32 %v1744_v22, %v1732_v55  ;;  %v1764_v40 = vmul.f32 %v4351_v0, %v4416_v44 }
 0x292   : > { %v1743_v37 = vmul.f32 %v4357_v53, %v1654_v17  ;;  %v1828_v54 = vadd.f32 %v1820_v28, %v1808_v31  ;;  %v1840_v4 = vmul.f32 %v4474_v51, %v4436_v13  ;;  %v1784_v15 = vmul.f32 %v4363_v32, %v1677_v35 }
 0x293   : > { %v1850_v52 = vadd.f32 %v1842_v39, %v1830_v6  ;;  %v1734_v21 = vadd.f32 %v1726_v41, %v1714_v18  ;;  %v1772_v14 = vadd.f32 %v1764_v40, %v1752_v30  ;;  %v1763_v55 = vmul.f32 %v4351_v0, %v4399_v56 }
 0x294   : > { %v1848_v58 = vadd.f32 %v1840_v4, %v1828_v54  ;;  %v1751_v59 = vadd.f32 %v1743_v37, %v4471_v42  ;;  %v1804_v10 = vmul.f32 %v4365_v33, %v1656_v46  ;;  %v1679_v17 = vsel %vm575_vm1, %v1641_v20, %v1642_v49 }
 0x295   : > { %1861 = vadd.xlane.f32.xlu1 %v1850_v52  ;;  %v1792_v3 = vadd.f32 %v1784_v15, %v1772_v14  ;;  %v1783_v13 = vmul.f32 %v4363_v32, %v4497_v7  ;;  %v1680_v5 = vsel %vm583_vm0, %v1679_v17, 0.0  ;;  %v1681_v56 = vsel %vm601_vm2, %v1664_v16, %v1657_v48 }
 0x296   : > { %1857 = vadd.xlane.f32.xlu0 %v1848_v58  ;;  %v1771_v39 = vadd.f32 %v1763_v55, %v1751_v59  ;;  %v1824_v11 = vmul.f32 %v4353_v26, %v4406_v61  ;;  %v1746_v12 = vmul.f32 %v4357_v53, %v1680_v5  ;;  %v1693_v49 = vmul.f32 %v4333_v60, %v1655_v2 }
 0x297   : > { %v1812_v42 = vadd.f32 %v1804_v10, %v1792_v3  ;;  %v1803_v7 = vmul.f32 %v4365_v33, %v1655_v2  ;;  %v1682_v43 = vsel %vm601_vm2, %v1681_v56, 0.0  ;;  %v1705_v24 = vmul.f32 %v4331_v57, %v4416_v44 }
 0x298   : > { %v1791_v20 = vadd.f32 %v1783_v13, %v1771_v39  ;;  %v1844_v48 = vmul.f32 %v4474_v51, %v4543_v19  ;;  %v1754_v16 = vadd.f32 %v1746_v12, %v1734_v21  ;;  %v1766_v9 = vmul.f32 %v4351_v0, %v4408_v1 }
 0x299   : > { %v1832_v62 = vadd.f32 %v1824_v11, %v1812_v42  ;;  %v1725_v63 = vmul.f32 %v4346_v23, %v1677_v35  ;;  %v1823_v25 = vmul.f32 %v4353_v26, %v4416_v44  ;;  %v1713_v27 = vadd.f32 %v1705_v24, %v1693_v49  ;;  %v2001_v49 = vld [vmem:[#allocation12] sm:$0xff]  ;;  %v2002_v24 = vld [vmem:[#allocation12 + $0x8] sm:$0xff] }
 0x29a   : > { %v1811_v60 = vadd.f32 %v1803_v7, %v1791_v20  ;;  %v1774_v8 = vadd.f32 %v1766_v9, %v1754_v16  ;;  %v1786_v50 = vmul.f32 %v4363_v32, %v1682_v43  ;;  %v1806_v57 = vmul.f32 0.0, %v4365_v33  ;;  %v2544_v20 = vld [vmem:[%s460_s4] ss:$0 sm:$0xff]  ;;  %s2098_s4 = scalar_lea.sflag [#allocation5], %s3998_s9 }
 0x29b   : > { %v1852_v38 = vadd.f32 %v1844_v48, %v1832_v62  ;;  %v1745_v2 = vmul.f32 %v4357_v53, %v1656_v46  ;;  %v1843_v36 = vmul.f32 %v4474_v51, %v1677_v35  ;;  %v1733_v22 = vadd.f32 %v1725_v63, %v1713_v27 }
 0x29c   : > { %v1831_v45 = vadd.f32 %v1823_v25, %v1811_v60  ;;  %v1794_v6 = vadd.f32 %v1786_v50, %v1774_v8  ;;  %v1826_v23 = vmul.f32 0.0, %v4353_v26  ;;  %v1765_v44 = vmul.f32 %v4351_v0, %v4406_v61 }
 0x29d   : > { %1865 = vadd.xlane.f32.xlu1 %v1852_v38  ;;  %v1753_v28 = vadd.f32 %v1745_v2, %v1733_v22  ;;  %v1846_v41 = vmul.f32 0.0, %v4474_v51  ;;  %v1785_v30 = vmul.f32 %v4363_v32, %v4543_v19  ;;  %v1805_v40 = vmul.f32 %v4365_v33, %v1680_v5 }
 0x29e   : > { %v1851_v31 = vadd.f32 %v1843_v36, %v1831_v45  ;;  %v1814_v18 = vadd.f32 %v1806_v57, %v1794_v6  ;;  %v1825_v54 = vmul.f32 %v4353_v26, %v4408_v1  ;;  %v1845_v0 = vmul.f32 %v4474_v51, %v1682_v43 }
 0x29f   : > { %v1773_v53 = vadd.f32 %v1765_v44, %v1753_v28  ;;  %v1881_v19 = vand.u32 127, %v565_v29  ;;  %vm1924_vm0 = vcmask 1046534   ;;  %vm1926_vm1 = vcmask 1047559  }
 0x2a0   : > { %1863 = vadd.xlane.f32.xlu0 %v1851_v31  ;;  %v1834_v46 = vadd.f32 %v1826_v23, %v1814_v18  ;;  %vm1928_vm2 = vcmask 64512   ;;  %v3505_v7 = vmov 0  }
 0x2a1   : > { %v1793_v35 = vadd.f32 %v1785_v30, %v1773_v53  ;;  %v1884_v33 = vsub.s32 %v1881_v19, %v4041_v34  ;;  %3013 = vset.pattern.permute.xlu0 %v3505_v7 }
 0x2a2   : > { %v1854_v37 = vadd.f32 %v1846_v41, %v1834_v46 }
 0x2a3   : > { %v1813_v52 = vadd.f32 %v1805_v40, %v1793_v35 }
 0x2a4   : > { %1869 = vadd.xlane.f32.xlu1 %v1854_v37 }
 0x2a5   : > { %v1833_v4 = vadd.f32 %v1825_v54, %v1813_v52 }
 0x2a7   : > { %v1853_v61 = vadd.f32 %v1845_v0, %v1833_v4 }
 0x2a9   : > { %1867 = vadd.xlane.f32.xlu0 %v1853_v61 }
 0x2bf   : > { %2010 = vperm.xlu0 %3013, %v2544_v20  }
 0x317   : > { %v1860_v21 = vpop.xlane.xlu1 %1859 }
 0x318   : > { %v1893_v59 = vrot.slane %v1860_v21, %v1884_v33 }
 0x319   : > { %v1856_v32 = vpop.xlane.xlu0 %1855 }
 0x31a   : > { %v1885_v26 = vrot.slane %v1856_v32, %v1884_v33 }
 0x322   : > { %v1862_v58 = vpop.xlane.xlu1 %1861 }
 0x323   : > { %v1858_v14 = vpop.xlane.xlu0 %1857  ;;  %v1897_v10 = vrot.slane %v1862_v58, %v1884_v33 }
 0x324   : > { %v1889_v15 = vrot.slane %v1858_v14, %v1884_v33 }
 0x326   : > { %v1915_v1 = vsel %vm1914_vm11, %v1889_v15, %v1885_v26 }
 0x327   : > { %v1917_v55 = vsel %vm1916_vm12, %v1893_v59, %v1915_v1 }
 0x328   : > { %v1919_v17 = vsel %vm1918_vm13, %v1897_v10, %v1917_v55 }
 0x32a   : > { %v1866_v3 = vpop.xlane.xlu1 %1865 }
 0x32b   : > { %v1905_v34 = vrot.slane %v1866_v3, %v1884_v33 }
 0x32d   : > { %v1864_v51 = vpop.xlane.xlu0 %1863 }
 0x32e   : > { %v1901_v47 = vrot.slane %v1864_v51, %v1884_v33 }
 0x330   : > { %v1921_v29 = vsel %vm1920_vm14, %v1901_v47, %v1919_v17 }
 0x331   : > { %v1870_v13 = vpop.xlane.xlu1 %1869  ;;  %v1923_v42 = vsel %vm1922_vm15, %v1905_v34, %v1921_v29 }
 0x332   : > { %v1913_v56 = vrot.slane %v1870_v13, %v1884_v33 }
 0x336   : > { %v1868_v39 = vpop.xlane.xlu0 %1867 }
 0x337   : > { %v1909_v5 = vrot.slane %v1868_v39, %v1884_v33 }
 0x339   : > { %v1925_v11 = vsel %vm1924_vm0, %v1909_v5, %v1923_v42 }
 0x33a   : > { %v1927_v12 = vsel %vm1926_vm1, %v1913_v56, %v1925_v11 }
 0x33b   : > { %2819 = vmatmul.mubr.msk.f32.vlgmr.msra.gmra.mrb[32].mxu1 %vm1928_vm2, %v1927_v12 }
 0x33c   : > { %2823 = vmatprep.mubr.msk.f32.mxu1 %vm1928_vm2, %v2001_v49 }
 0x40e   : > { %v1997_v43 = vpop.f32.mrb[32].mxu1 }
 0x40f   : > { %v2820_v62 = vpop.f32.mrb[33].mxu1  ;;  %2821 = vmatprep.subr.mxu1 %v1997_v43 }
 0x410   : > { %2822 = vmatpush3.msra.mxu1 %v1997_v43 }
 0x411   : > { %2824 = vmatmul.mubr.msk.f32.vlgmr.msra.gmra.mrb[34].mxu1 %vm1928_vm2, %v2002_v24 }
 0x412   : > { %3312 = shalt.err (!%p3309_p2)
}
 0x413   : > { %s3313_s8 = scalar_lea.hbm %s4623_s12, 512  ;;  %s3317_s1 = scalar_lea.hbm %s4863_s7, 2048 }
 0x414   : > { %p3314_p10 = scmp.ne.s32.totalorder %s4623_s12, %s3313_s8  ;;  %p3318_p5 = scmp.lt.u32.totalorder %s4623_s12, %s4863_s7 }
 0x415   : > { %p3319_p3 = scmp.lt.u32.totalorder %s3317_s1, %s3313_s8  ;;  %p3321_p4 = scmp.lt.u32.totalorder %s3313_s8, %s4623_s12 }
 0x416   : > { %p3315_p11 = pnand %p3314_p10, %p4864_p6 }
 0x417   : > { %p3320_p1 = por %p3319_p3, %p3318_p5 }
 0x418   : > { %p3316_p13 = pneg %p3315_p11 }
 0x419   : > { %p3322_p8 = por %p3321_p4, %p3320_p1 }
 0x41b   : > { %p3323_p7 = pnand %p3322_p8, %p3316_p13 }
 0x41d   : > { %3326 = shalt.err (!%p3323_p7)
}
 0x41e   : > { %s3507_s3 = smov 64   ;;  %s3508_s11 = smov 4   ;;  %v2011_v48 = vpop.permute.xlu0 %2010  ;;  %vm2094_vm3 = vcmask 130048  }
 0x41f   : > { %2847 = dma.vmem_to_hbm [thread:$0]  (%p4864_p6), %s4618_s28, 512, %s4623_s12, %s2098_s4, %s3507_s3, %s3507_s3, %s3508_s11  }
 0x420   : > { %s2568_s21 = sshll.u32 %s4614_s14, 8  ;;  %s2136_s22 = sshll.u32 %s4004_s30, 4  ;;  %s4656_s22 = int_to_ptr.vmem [resolvable:$true] %s2136_s22 }
 0x421   : > { %s4865_s8 = sld [smem:[#allocation45_spill]]  ;;  %s2103_s28 = scalar_lea.sflag [#allocation17], %s3998_s9 }
 0x422   : > { %s3327_s14 = scalar_lea.vmem %s4656_s22, 256  ;;  %s3509_s12 = smov [#allocation16]  }
 0x423   : > { %p3328_p9 = scmp.ne.s32.totalorder %s4656_s22, %s3327_s14  ;;  %s3331_s4 = sshll.u32 %s3509_s12, 4  ;;  %s3332_s4 = int_to_ptr.vmem [resolvable:$false] %s3331_s4 }
 0x424   : > { %s3333_s6 = scalar_lea.vmem %s3332_s4, 512  ;;  %p3334_p2 = scmp.lt.s32.totalorder %s4656_s22, %s3332_s4 }
 0x425   : > { %p3329_p12 = pnand %p3328_p9, %p4864_p6  ;;  %p3335_p10 = scmp.lt.s32.totalorder %s3333_s6, %s3327_s14 }
 0x427   : > { %s4654_s26 = scalar_lea.hbm %s4865_s8, %s2568_s21  ;;  %p3330_p0 = pneg %p3329_p12 }
 0x428   : > { %p3336_p11 = por %p3335_p10, %p3334_p2 }
 0x42a   : > { %p3337_p13 = pnand %p3336_p11, %p3330_p0 }
 0x4e4   : > { %v2825_v16 = vpop.f32.mrb[34].mxu1 }
 0x4e5   : > { %v2085_v9 = vpop.f32.mrb[35].mxu1  ;;  %v2091_v63 = vadd.f32 %v2825_v16, %v2011_v48 }
 0x4e6   : > { %v2086_v60 = vadd.f32 %v2085_v9, %v2011_v48 }
 0x4e7   : > { %2096 = vst.msk [vmem:[%s4004_s30 + $0x8] sm:$0xff] %vm2094_vm3, %v2091_v63 }
 0x4e8   : > { %2095 = vst.msk [vmem:[%s4004_s30] sm:$0xff] %vm2094_vm3, %v2086_v60 }
 0x4e9   : > { %3340 = shalt.err (!%p3337_p13)
}
 0x4ea   : > { %s3341_s30 = scalar_lea.hbm %s4654_s26, 256  ;;  %s3345_s23 = scalar_lea.hbm %s4865_s8, 1024 }
 0x4eb   : > { %p3342_p5 = scmp.ne.s32.totalorder %s4654_s26, %s3341_s30  ;;  %p3346_p4 = scmp.lt.u32.totalorder %s4654_s26, %s4865_s8 }
 0x4ec   : > { %p3347_p8 = scmp.lt.u32.totalorder %s3345_s23, %s3341_s30  ;;  %p3349_p9 = scmp.lt.u32.totalorder %s3341_s30, %s4654_s26 }
 0x4ed   : > { %p3343_p3 = pnand %p3342_p5, %p4864_p6 }
 0x4ee   : > { %p3348_p7 = por %p3347_p8, %p3346_p4 }
 0x4ef   : > { %p3344_p1 = pneg %p3343_p3 }
 0x4f0   : > { %p3350_p12 = por %p3349_p9, %p3348_p7 }
 0x4f2   : > { %p3351_p0 = pnand %p3350_p12, %p3344_p1 }
 0x4f4   : > { %3354 = shalt.err (!%p3351_p0)
}
 0x4f5   : > { %s3510_s21 = smov 128   ;;  %s3511_s20 = smov 8  }
 0x4f6   : > { %2848 = dma.vmem_to_hbm [thread:$0]  (%p4864_p6), %s4656_s22, 256, %s4654_s26, %s2103_s28, %s3510_s21, %s3510_s21, %s3511_s20  }
 0x4f7 PF: > { %s4866_s10 = sld [smem:[#allocation24_spill]]  ;;  %s4867_s14 = sld [smem:[#allocation35_spill]] }
 0x4f8   : > { %p2886_p2 = scmp.ge.s32.totalorder %s3489_s18, 2 }
 0x4fd   : > { %s2151_s12 = sand.u32 1, %s4866_s10   ;;  %p4868_p10 = scmp.ne.s32.totalorder %s4867_s14, 0 }
 0x4fe   : > { %s2152_s4 = scalar_lea.sflag [#allocation5], %s2151_s12 }
 0x4ff   : > { %p2875_p11 = pnand %p2886_p2, %p4868_p10 }
 0x501   : > { %3428 = dma.done.wait (!%p2875_p11), %s2152_s4, 512  }
 0x502   : > { %3430 = vsyncadd (!%p2875_p11), %s2152_s4, 4294966784  ;;  %s2161_s6 = scalar_lea.sflag [#allocation17], %s2151_s12 }
 0x503   : > { %3432 = dma.done.wait (!%p2875_p11), %s2161_s6, 256  }
 0x504   : > { %3434 = vsyncadd (!%p2875_p11), %s2161_s6, 4294967040  ;;  %s35_s18 = sadd.s32 1, %s3489_s18   ;;  %s4870_s9 = sld [smem:[#allocation25_spill]] }
 0x505   : > { %p4689_p13 = scmp.ge.s32.totalorder %s35_s18, 6   ;;  %s4871_s30 = sld [smem:[#allocation26_spill]] }
 0x506   : > { %s4872_s22 = sld [smem:[#allocation27_spill]]  ;;  %s4873_s10 = sld [smem:[#allocation38_spill]] }
 0x507   : > { %s4874_s11 = sld [smem:[#allocation28_spill]]  ;;  %s4875_s26 = sld [smem:[#allocation37_spill]] }
 0x508   : > { %s4878_s28 = smov %s3445_s29  ;;  %s4879_s29 = smov %s3859_s24 }
 0x509   : > { %s4881_s12 = smov %s3469_s13  ;;  %s4882_s13 = smov %s3854_s19 }
 0x50a   : > { %s4877_s27 = smov %s4870_s9  ;;  %s4883_s14 = smov %s3481_s16 }
 0x50b   : > { %s4884_s15 = smov %s3485_s17  ;;  %s4886_s17 = smov %s4892_s5 }
 0x50c   : > { %s4880_s9 = smov %s4872_s22  ;;  %34 = sbr.rel (!%p4689_p13) target bundleno = 25 (0x19), region = 170 }
 0x50d   : > { %s4885_s16 = smov %s4875_s26 }
 0x513   :  { %2166 = vsyncpa [#allocation4], 1 }
 0x514   :  { %2168 = vsyncpa [#allocation4 + $0x1], 1 }
 0x515   :  { %2169 = vsyncpa [#allocation7], 1 }
 0x516   :  { %2171 = vsyncpa [#allocation7 + $0x1], 1 }
 0x517   :  { %2172 = vsyncpa [#allocation10], 1 }
 0x518   :  { %2174 = vsyncpa [#allocation10 + $0x1], 1 }
 0x519   :  { %2175 = vsyncpa [#allocation13], 1 }
 0x51a   :  { %2176 = vsyncpa [#allocation5], 1 }
 0x51b   :  { %2178 = vsyncpa [#allocation5 + $0x1], 1 }
 0x51c   :  { %2179 = vsyncpa [#allocation17], 1 }
 0x51d   :  { %2181 = vsyncpa [#allocation17 + $0x1], 1 }

</bundles_post_ra>
